<compile_context>
chip_gen: v6e
topology: v6e:2x2x1
jax: 0.10.0
libtpu: 0.0.40
codegen_flags: <defaults>
</compile_context>

<pallas_src>
import functools
import math

import numpy as np
import jax
import jax.numpy as jnp
from jax.experimental import pallas as pl
from jax.experimental.pallas import tpu as pltpu


# ----------------------------------------------------------------------------------
# small helpers
# ----------------------------------------------------------------------------------
def _rup(x, m):
    return ((x + m - 1) // m) * m


def _pair(v):
    return (v, v) if isinstance(v, int) else (int(v[0]), int(v[1]))


_RNG = np.random.RandomState(0)


def _winit_np(shape, fan_in):
    return (_RNG.randn(*shape) * np.sqrt(2.0 / float(fan_in))).astype(np.float32)


def _pad_vec(v, npad):
    out = np.zeros((1, npad), np.float32)
    out[0, :v.shape[0]] = v
    return jnp.asarray(out)


# ----------------------------------------------------------------------------------
# Pallas fused matmul  (im2col patches @ weights, + affine + activation [+ residual])
# ----------------------------------------------------------------------------------
_TM = 512        # row tile
_TN_MAX = 256    # output-channel tile (feeds the 256-wide MXU on v6e/v7x)
_TK_MAX = 2304   # contraction tile cap: keeps double-buffered VMEM ~9 MB (v5e/v7x safe)


def _pick_tk(kp):
    if kp <= _TK_MAX:
        return kp
    for d in range(_TK_MAX, 127, -128):
        if kp % d == 0:
            return d
    return 128


@functools.lru_cache(maxsize=None)
def _get_mm(Mp, Kp, Np, TN, TK, kind):
    """Returns a jitted pallas_call:  out = epilogue(A @ B) with A:(Mp,Kp) bf16,
    B:(Kp,Np) bf16, per-channel scale/shift/negslope vectors, optional residual."""

    def kernel(a_ref, b_ref, s_ref, c_ref, n_ref, *rest):
        if kind == "res":
            r_ref, o_ref, acc_ref = rest
        else:
            o_ref, acc_ref = rest

        @pl.when(pl.program_id(2) == 0)
        def _():
            acc_ref[...] = jnp.zeros_like(acc_ref)

        acc_ref[...] += jnp.dot(a_ref[...], b_ref[...],
                                preferred_element_type=jnp.float32)

        @pl.when(pl.program_id(2) == pl.num_programs(2) - 1)
        def _():
            y = acc_ref[...] * s_ref[...] + c_ref[...]
            if kind == "gelu":
                # TODO(synk): tanh approximation vs torch's exact erf GELU.
                y = jax.nn.gelu(y, approximate=True)
            else:
                # none / relu / leaky via per-channel negative slope.
                y = jnp.maximum(y, 0.0) + n_ref[...] * jnp.minimum(y, 0.0)
            if kind == "res":
                y = y + r_ref[...]
            o_ref[...] = y

    in_specs = [
        pl.BlockSpec((_TM, TK), lambda i, j, k: (i, k)),
        pl.BlockSpec((TK, TN), lambda i, j, k: (k, j)),
        pl.BlockSpec((1, TN), lambda i, j, k: (0, j)),
        pl.BlockSpec((1, TN), lambda i, j, k: (0, j)),
        pl.BlockSpec((1, TN), lambda i, j, k: (0, j)),
    ]
    if kind == "res":
        in_specs.append(pl.BlockSpec((_TM, TN), lambda i, j, k: (i, j)))

    call = pl.pallas_call(
        kernel,
        out_shape=jax.ShapeDtypeStruct((Mp, Np), jnp.float32),
        grid_spec=pltpu.PrefetchScalarGridSpec(
            num_scalar_prefetch=0,
            grid=(Mp // _TM, Np // TN, Kp // TK),
            in_specs=in_specs,
            out_specs=pl.BlockSpec((_TM, TN), lambda i, j, k: (i, j)),
            scratch_shapes=[pltpu.VMEM((_TM, TN), jnp.float32)],
        ),
        compiler_params=pltpu.CompilerParams(
            dimension_semantics=("parallel", "parallel", "arbitrary")),
    )
    return jax.jit(call)


def matmul_fused(a, w, scale, shift, negslope, act_kind="param", residual=None):
    """out = act((a @ w) * scale + shift) [+ residual].  a:(M,K) any float dtype,
    w:(Kp,Np) bf16 pre-padded; returns the full padded (Mp,Np) f32 result."""
    M, K = a.shape
    Kp, Np = w.shape
    Mp = _rup(M, _TM)
    if a.dtype != jnp.bfloat16:
        a = a.astype(jnp.bfloat16)
    if (Mp - M) or (Kp - K):
        a = jnp.pad(a, ((0, Mp - M), (0, Kp - K)))

    kind = act_kind
    args = [a, w, scale, shift, negslope]
    if residual is not None:
        kind = "res"
        r = residual.astype(jnp.float32)
        if r.shape != (Mp, Np):
            r = jnp.pad(r, ((0, Mp - r.shape[0]), (0, Np - r.shape[1])))
        args.append(r)

    TN = min(_TN_MAX, Np)
    TK = _pick_tk(Kp)
    return _get_mm(Mp, Kp, Np, TN, TK, kind)(*args)


# ----------------------------------------------------------------------------------
# Layers (NHWC).  Convolutions -> Pallas matmul; cheap glue stays in plain JAX.
# ----------------------------------------------------------------------------------
class IdentityL:
    def __call__(self, x):
        return x


class Conv2dL:
    """Conv2d (+ optional fused eval-mode BatchNorm) + fused activation."""

    _NS = {"none": 1.0, "relu": 0.0, "leaky": 0.01}

    def __init__(self, cin, cout, k, stride=1, padding=0, dilation=1,
                 with_bn=False, act="none"):
        self.kh, self.kw = _pair(k)
        self.sh, self.sw = _pair(stride)
        self.ph, self.pw = _pair(padding)
        self.dh, self.dw = _pair(dilation)
        self.cin, self.cout = cin, cout
        K = self.kh * self.kw * cin
        self.K = K
        Kp, Np = _rup(K, 128), _rup(cout, 128)
        w = np.zeros((Kp, Np), np.float32)
        w[:K, :cout] = _winit_np((K, cout), K)
        self.w = jnp.asarray(w, jnp.bfloat16)

        bias = np.zeros((cout,), np.float32)
        if with_bn:  # eval-mode BN with fresh-init stats folded into the epilogue
            s = np.full((cout,), 1.0 / np.sqrt(1.0 + 1e-5), np.float32)
            c = bias * s
        else:
            s = np.ones((cout,), np.float32)
            c = bias
        self.scale = _pad_vec(s, Np)
        self.shift = _pad_vec(c, Np)
        self.negslope = _pad_vec(np.full((cout,), self._NS[act], np.float32), Np)

    def __call__(self, x):
        N, H, W, C = x.shape
        kh, kw, sh, sw = self.kh, self.kw, self.sh, self.sw
        ph, pw, dh, dw = self.ph, self.pw, self.dh, self.dw
        Ho = (H + 2 * ph - dh * (kh - 1) - 1) // sh + 1
        Wo = (W + 2 * pw - dw * (kw - 1) - 1) // sw + 1

        xb = x.astype(jnp.bfloat16)          # cast before im2col -> half the copy cost
        if kh == 1 and kw == 1 and sh == 1 and sw == 1 and ph == 0 and pw == 0:
            patches = xb.reshape(N * H * W, C)
        else:
            if ph or pw:
                xb = jnp.pad(xb, ((0, 0), (ph, ph), (pw, pw), (0, 0)))
            cols = []
            for i in range(kh):
                for j in range(kw):
                    h0, w0 = i * dh, j * dw
                    cols.append(xb[:, h0:h0 + (Ho - 1) * sh + 1:sh,
                                   w0:w0 + (Wo - 1) * sw + 1:sw, :])
            patches = cols[0] if len(cols) == 1 else jnp.concatenate(cols, axis=-1)
            patches = patches.reshape(N * Ho * Wo, kh * kw * C)

        out = matmul_fused(patches, self.w, self.scale, self.shift, self.negslope)
        return out[:N * Ho * Wo, :self.cout].reshape(N, Ho, Wo, self.cout)


class BatchNorm2dL:
    """Eval-mode BatchNorm2d with fresh-init running stats (plain JAX glue)."""

    def __init__(self, c):
        self.scale = jnp.full((c,), 1.0 / np.sqrt(1.0 + 1e-5), jnp.float32)
        self.shift = jnp.zeros((c,), jnp.float32)

    def __call__(self, x):
        return x * self.scale + self.shift


class ActL:
    def __init__(self, kind):
        self.kind = kind

    def __call__(self, x):
        if self.kind == "relu":
            return jnp.maximum(x, 0.0)
        return jnp.where(x > 0, x, 0.01 * x)          # leaky(0.01)


class MaxPool2dL:
    def __init__(self, kernel, stride, padding=0, ceil_mode=False):
        self.k, self.s, self.p, self.ceil = kernel, stride, padding, ceil_mode

    def _osize(self, n):
        v = (n + 2 * self.p - self.k) / self.s
        v = math.ceil(v) if self.ceil else math.floor(v)
        return int(v) + 1

    def __call__(self, x):
        N, H, W, C = x.shape
        k, s, p = self.k, self.s, self.p
        Ho, Wo = self._osize(H), self._osize(W)
        Hn, Wn = (Ho - 1) * s + k, (Wo - 1) * s + k
        eh, ew = max(0, Hn - (H + 2 * p)), max(0, Wn - (W + 2 * p))
        if p or eh or ew:
            x = jnp.pad(x, ((0, 0), (p, p + eh), (p, p + ew), (0, 0)),
                        constant_values=-jnp.inf)
        out = None
        for i in range(k):
            for j in range(k):
                t = x[:, i:i + (Ho - 1) * s + 1:s, j:j + (Wo - 1) * s + 1:s, :]
                out = t if out is None else jnp.maximum(out, t)
        return out


class SELayerL:
    """Canonical squeeze-excitation (TODO(synk): SELayer not in reference source)."""

    def __init__(self, c, reduction=16):
        r = max(1, c // reduction)
        self.w1 = jnp.asarray(_winit_np((c, r), c))
        self.w2 = jnp.asarray(_winit_np((r, c), r))

    def __call__(self, x):
        s = jnp.mean(x, axis=(1, 2))                     # (N, C) global average pool
        h = jnp.maximum(s @ self.w1, 0.0)
        g = jax.nn.sigmoid(h @ self.w2)
        return x * g[:, None, None, :]


class BlockL:
    """Canonical ConvNeXt block (TODO(synk): Block not in reference source):
    dw7x7 -> LN -> 1x1(4x) -> GELU -> 1x1 -> layer-scale -> residual (drop_path=0).
    Both pointwise matmuls run in the Pallas kernel; gamma + residual are fused into
    the second matmul's epilogue."""

    def __init__(self, dim, layer_scale_init_value=1e-6):
        self.dim = dim
        hid = 4 * dim
        self.dw_w = jnp.asarray(_winit_np((7, 7, 1, dim), 49))
        self.dw_b = jnp.zeros((dim,), jnp.float32)
        self.ln_w = jnp.ones((dim,), jnp.float32)
        self.ln_b = jnp.zeros((dim,), jnp.float32)

        Kp1, Np1 = _rup(dim, 128), _rup(hid, 128)
        w1 = np.zeros((Kp1, Np1), np.float32)
        w1[:dim, :hid] = _winit_np((dim, hid), dim)
        self.pw1_w = jnp.asarray(w1, jnp.bfloat16)
        self.pw1_scale = _pad_vec(np.ones(hid, np.float32), Np1)
        self.pw1_shift = _pad_vec(np.zeros(hid, np.float32), Np1)
        self.pw1_ns = self.pw1_scale                      # unused by the gelu epilogue

        Kp2, Np2 = _rup(hid, 128), _rup(dim, 128)
        w2 = np.zeros((Kp2, Np2), np.float32)
        w2[:hid, :dim] = _winit_np((hid, dim), hid)
        self.pw2_w = jnp.asarray(w2, jnp.bfloat16)
        gamma = np.full((dim,), layer_scale_init_value, np.float32)
        self.pw2_scale = _pad_vec(gamma, Np2)             # layer-scale folded in
        self.pw2_shift = _pad_vec(np.zeros(dim, np.float32), Np2)
        self.pw2_ns = _pad_vec(np.ones(dim, np.float32), Np2)

    def __call__(self, x):
        N, H, W, C = x.shape
        M = N * H * W
        res2d = x.reshape(M, C)
        # 7x7 depthwise (negligible FLOPs) stays in XLA.
        h = jax.lax.conv_general_dilated(
            x, self.dw_w, (1, 1), ((3, 3), (3, 3)),
            dimension_numbers=("NHWC", "HWIO", "NHWC"),
            feature_group_count=C) + self.dw_b
        h2 = h.reshape(M, C)
        mu = jnp.mean(h2, axis=-1, keepdims=True)
        xc = h2 - mu
        var = jnp.mean(xc * xc, axis=-1, keepdims=True)
        h2 = xc * jax.lax.rsqrt(var + 1e-6) * self.ln_w + self.ln_b

        g = matmul_fused(h2, self.pw1_w, self.pw1_scale, self.pw1_shift,
                         self.pw1_ns, act_kind="gelu")
        # g is already (Mp, 4C) padded -> feed straight into pw2 (no re-pad).
        out = matmul_fused(g, self.pw2_w, self.pw2_scale, self.pw2_shift,
                           self.pw2_ns, residual=res2d)
        return out[:M, :C].reshape(N, H, W, C)


class UpsampleBilinear2xL:
    """nn.Upsample(scale_factor=2, mode='bilinear', align_corners=True) (JAX glue)."""

    def __call__(self, x):
        def lerp_axis(arr, axis):
            n = arr.shape[axis]
            m = 2 * n
            if n == 1:
                reps = [1, 1, 1, 1]
                reps[axis] = 2
                return jnp.tile(arr, reps)
            src = np.arange(m) * (n - 1) / (m - 1)
            i0 = np.floor(src).astype(np.int32)
            i1 = np.minimum(i0 + 1, n - 1)
            w = jnp.asarray((src - i0).astype(np.float32))
            shape = [1, 1, 1, 1]
            shape[axis] = m
            w = w.reshape(shape)
            a0 = jnp.take(arr, jnp.asarray(i0), axis=axis)
            a1 = jnp.take(arr, jnp.asarray(i1), axis=axis)
            return a0 * (1.0 - w) + a1 * w
        return lerp_axis(lerp_axis(x, 1), 2)


# ----------------------------------------------------------------------------------
# composite blocks & module lists (mirror the torch builders)
# ----------------------------------------------------------------------------------
def conv_blockL(in_dim, out_dim, kernel_size=3, stride=1, padding=1, dilation=1):
    return Conv2dL(in_dim, out_dim, kernel_size, stride, padding, dilation,
                   with_bn=True, act="leaky")


class AsymInceptionL:
    def __init__(self, in_dim, out_dim, kernel_size=3, padding=1, dilation=1):
        self.c1 = Conv2dL(in_dim, out_dim, (kernel_size, 1), 1, (padding, 0),
                          (dilation, 1), with_bn=True, act="relu")
        self.c2 = Conv2dL(out_dim, out_dim, (1, kernel_size), 1, (0, padding),
                          (1, dilation), with_bn=True, act="relu")

    def __call__(self, x):
        return self.c2(self.c1(x))


class ConvResidualInceptionL:
    def __init__(self, in_dim, out_dim):
        self.conv_1 = conv_blockL(in_dim, out_dim)
        self.conv_2_1 = AsymInceptionL(out_dim, out_dim, 1, 0, 1)
        self.conv_2_2 = AsymInceptionL(out_dim, out_dim, 3, 1, 1)
        self.conv_2_3 = AsymInceptionL(out_dim, out_dim, 5, 2, 1)
        self.conv_2_4 = AsymInceptionL(out_dim, out_dim, 3, 2, 2)
        self.conv_2_5 = AsymInceptionL(out_dim, out_dim, 3, 4, 4)
        self.conv_2_output = Conv2dL(out_dim * 5, out_dim, 1, 1, 0, 1,
                                     with_bn=True, act="leaky")
        self.conv_3 = conv_blockL(out_dim, out_dim)

    def __call__(self, x):
        c1 = self.conv_1(x)
        b = jnp.concatenate(
            [self.conv_2_1(c1), self.conv_2_2(c1), self.conv_2_3(c1),
             self.conv_2_4(c1), self.conv_2_5(c1)], axis=-1)
        out1 = self.conv_2_output(b)
        return self.conv_3(out1 + c1)


def build_vgg():
    """Canonical SSD VGG16.  TODO(synk): add_vgg was not given in the reference file.
    ReLUs that the forward() actually applies are fused into the preceding conv;
    their list slots become Identity so indexing matches the torch ModuleList."""
    I = IdentityL
    v = [None] * 35
    v[0], v[1] = Conv2dL(3, 64, 3, padding=1, act="relu"), I()
    v[2], v[3] = Conv2dL(64, 64, 3, padding=1, act="none"), I()     # vgg[3] unused
    v[4] = MaxPool2dL(2, 2)
    v[5], v[6] = Conv2dL(64, 128, 3, padding=1, act="relu"), I()
    v[7], v[8] = Conv2dL(128, 128, 3, padding=1, act="none"), I()   # vgg[8] unused
    v[9] = MaxPool2dL(2, 2)
    v[10], v[11] = Conv2dL(128, 256, 3, padding=1, act="relu"), I()
    v[12], v[13] = Conv2dL(256, 256, 3, padding=1, act="relu"), I()
    v[14], v[15] = Conv2dL(256, 256, 3, padding=1, act="none"), I()
    v[16] = MaxPool2dL(2, 2, ceil_mode=True)
    v[17], v[18] = Conv2dL(256, 512, 3, padding=1, act="relu"), I()
    v[19], v[20] = Conv2dL(512, 512, 3, padding=1, act="relu"), I()
    v[21], v[22] = Conv2dL(512, 512, 3, padding=1, act="none"), I()
    v[23] = MaxPool2dL(2, 2)
    v[24], v[25] = Conv2dL(512, 512, 3, padding=1, act="relu"), I()
    v[26], v[27] = Conv2dL(512, 512, 3, padding=1, act="relu"), I()
    v[28], v[29] = Conv2dL(512, 512, 3, padding=1, act="relu"), I()
    v[30] = MaxPool2dL(3, 1, padding=1)
    v[31], v[32] = Conv2dL(512, 1024, 3, padding=6, dilation=6, act="relu"), I()
    v[33], v[34] = Conv2dL(1024, 1024, 1, act="none"), I()
    return v


def build_extras():
    return [Conv2dL(1024, 256, 1), Conv2dL(256, 512, 3, 2, 1),
            Conv2dL(512, 128, 1), Conv2dL(128, 256, 3, 2, 1),
            Conv2dL(256, 128, 1), Conv2dL(128, 256, 3)]


def build_conv1x1():
    return [Conv2dL(256, 128, 1), Conv2dL(128, 256, 3)]


def build_lvdnet():
    L = [IdentityL()]
    chans = [(3, 64), (64, 128), (128, 256), (256, 512),
             (512, 1024), (1024, 512), (512, 256), (256, 256)]
    pool_ceil = [False, False, True, False, True, False, True]
    for idx, (ci, co) in enumerate(chans):
        L.append(ConvResidualInceptionL(ci, co))
        L.append(BatchNorm2dL(co))
        L.append(ActL("leaky"))
        if idx < 7:
            L.append(MaxPool2dL(2, 2, ceil_mode=pool_ceil[idx]))
    return L


def build_selayer(flag=True):
    layers = [SELayerL(64), SELayerL(128), SELayerL(256), SELayerL(512),
              SELayerL(1024), SELayerL(512), SELayerL(256), SELayerL(256)]
    if not flag:
        layers.reverse()
    return layers


def build_up():
    up = [UpsampleBilinear2xL(), Conv2dL(256, 256, 2, 1, 1),
          UpsampleBilinear2xL(), Conv2dL(256, 256, 2, 1, 0),
          UpsampleBilinear2xL(), Conv2dL(256, 512, 3, 1, 1),
          UpsampleBilinear2xL(), Conv2dL(512, 1024, 2, 1, 0),
          UpsampleBilinear2xL(), Conv2dL(1024, 512, 3, 1, 1),
          UpsampleBilinear2xL(), Conv2dL(512, 256, 2, 1, 0)]

    def group(cin, dim):
        return [Conv2dL(cin, dim, 3, 1, 1), BlockL(dim), BlockL(dim),
                BatchNorm2dL(dim), ActL("relu")]

    upconv = (group(512, 256) + group(512, 256) + group(1024, 512)
              + group(2048, 1024) + group(1024, 512) + group(512, 256))
    return up, upconv


# ----------------------------------------------------------------------------------
# MYMODEL37
# ----------------------------------------------------------------------------------
class MYMODEL37Pallas:
    def __init__(self, num_classes):
        self.num_classes = num_classes
        self.vgg = build_vgg()
        self.extras = build_extras()
        # L2Norm00/01/02 exist in the torch __init__ but are unused in forward().
        mbox = [2, 2, 2, 2, 2, 2]
        src_channels = [256, 512, 1024, 512, 256, 256]
        self.loc = [Conv2dL(c, mbox[k] * 4, 3, padding=1)
                    for k, c in enumerate(src_channels)]
        self.conf = [Conv2dL(c, mbox[k] * num_classes, 3, padding=1)
                     for k, c in enumerate(src_channels)]
        self.up, self.upconv = build_up()
        self.downselayer = build_selayer(True)
        self.upselayer = build_selayer(False)
        self.conv1x1 = build_conv1x1()
        self.lvdnet = build_lvdnet()

    def __call__(self, x_nchw):
        x = jnp.transpose(x_nchw, (0, 2, 3, 1)).astype(jnp.float32)  # NCHW -> NHWC
        sources, loc, conf = [], [], []
        cse = 0

        x1 = self.lvdnet[0](x); x1 = self.lvdnet[1](x1)
        x = self.vgg[0](x); x = self.vgg[1](x); x = self.vgg[2](x)
        x = self.downselayer[cse](x); cse += 1
        x = x + x1
        x = self.lvdnet[2](x); x = self.lvdnet[3](x)

        x1 = self.lvdnet[4](x); x1 = self.lvdnet[5](x1)
        x = self.vgg[4](x); x = self.vgg[5](x); x = self.vgg[6](x); x = self.vgg[7](x)
        x = self.downselayer[cse](x); cse += 1
        x = x + x1
        x = self.lvdnet[6](x); x = self.lvdnet[7](x)

        x1 = self.lvdnet[8](x); x1 = self.lvdnet[9](x1)
        for i in range(9, 15):
            x = self.vgg[i](x)
        x = x + x1
        x = self.lvdnet[10](x)
        x = self.downselayer[cse](x); cse += 1
        sources.append(x)
        x = self.lvdnet[11](x)

        x1 = self.lvdnet[12](x); x1 = self.lvdnet[13](x1)
        for i in range(16, 22):
            x = self.vgg[i](x)
        x = x + x1
        x = self.lvdnet[14](x)
        x = self.downselayer[cse](x); cse += 1
        sources.append(x)
        x = self.lvdnet[15](x)

        x1 = self.lvdnet[16](x); x1 = self.lvdnet[17](x1)
        for i in range(23, 34):
            x = self.vgg[i](x)
        x = x + x1
        x = self.lvdnet[18](x)
        x = self.downselayer[cse](x); cse += 1
        sources.append(x)
        x = self.lvdnet[19](x)

        x1 = self.lvdnet[20](x); x1 = self.lvdnet[21](x1)
        x = self.extras[0](x); x = self.extras[1](x)
        x = x + x1
        x = self.lvdnet[22](x)
        x = self.downselayer[cse](x); cse += 1
        sources.append(x)
        x = self.lvdnet[23](x)

        x1 = self.lvdnet[24](x); x1 = self.lvdnet[25](x1)
        x = self.extras[2](x); x = self.extras[3](x)
        x = x + x1
        x = self.lvdnet[26](x)
        x = self.downselayer[cse](x); cse += 1
        sources.append(x)
        x = self.lvdnet[27](x)

        x1 = self.lvdnet[28](x); x1 = self.lvdnet[29](x1)
        x = self.extras[4](x); x = self.extras[5](x)
        x = x + x1
        x = self.lvdnet[30](x)
        x = self.downselayer[cse](x); cse += 1
        sources.append(x)
        x = self.lvdnet[31](x)

        for i in range(len(self.conv1x1)):
            x = self.conv1x1[i](x)
        sources.append(x)

        downlen = len(sources)
        cse = 0
        for i in range(len(self.up) // 2):
            x = self.up[2 * i](x)
            x = self.up[2 * i + 1](x)
            x = jnp.concatenate([x, sources[downlen - 2 - i]], axis=-1)
            for k in range(5):
                x = self.upconv[5 * i + k](x)
                if k == 4:
                    x = self.upselayer[cse](x); cse += 1
                    sources.append(x)

        srcs = sources[-6:][::-1]
        for xs, l, c in zip(srcs, self.loc, self.conf):
            # NHWC conv output already equals the torch output permuted to (0,2,3,1)
            loc.append(l(xs).reshape(xs.shape[0], -1))
            conf.append(c(xs).reshape(xs.shape[0], -1))
        loc = jnp.concatenate(loc, axis=1)
        conf = jnp.concatenate(conf, axis=1)
        return (loc.reshape(loc.shape[0], -1, 4),
                conf.reshape(conf.shape[0], -1, self.num_classes))


if __name__ == "__main__":
    num_classes = 4
    model = MYMODEL37Pallas(num_classes)
    key = jax.random.PRNGKey(0)
    # The architecture's down/up spatial arithmetic pins the input to 300x300
    # (SSD300-style pyramid 75/38/19/10/5/3/1); batch is kept at 1 to stay small.
    x = jax.random.normal(key, (1, 3, 300, 300), jnp.float32)
    loc, conf = model(x)
    loc, conf = jax.block_until_ready((loc, conf))
    assert loc.ndim == 3 and loc.shape[0] == 1 and loc.shape[-1] == 4
    assert conf.ndim == 3 and conf.shape[-1] == num_classes
    assert loc.shape[1] == conf.shape[1]
    print("KERNEL_OK")
</pallas_src>

<mosaic_0001>
module attributes {stable_mosaic.version = 11 : i64} {
  func.func @kernel(%arg0: i32, %arg1: i32, %arg2: i32, %arg3: memref<512x128xbf16, #tpu.memory_space<vmem>>, %arg4: memref<128x128xbf16, #tpu.memory_space<vmem>>, %arg5: memref<1x128xf32, #tpu.memory_space<vmem>>, %arg6: memref<1x128xf32, #tpu.memory_space<vmem>>, %arg7: memref<1x128xf32, #tpu.memory_space<vmem>>, %arg8: memref<512x128xf32, #tpu.memory_space<vmem>>, %arg9: memref<512x128xf32, #tpu.memory_space<vmem>>) attributes {dimension_semantics = [#tpu.dimension_semantics<parallel>, #tpu.dimension_semantics<parallel>, #tpu.dimension_semantics<arbitrary>], iteration_bounds = array<i64: 176, 1, 1>, scalar_prefetch = 0 : i64, scratch_operands = 1 : i64, tpu.core_type = #tpu.core_type<tc>, window_params = [{transform_indices = @transform_0, window_bounds = array<i64: 512, 128>}, {transform_indices = @transform_1, window_bounds = array<i64: 128, 128>}, {transform_indices = @transform_2, window_bounds = array<i64: 1, 128>}, {transform_indices = @transform_3, window_bounds = array<i64: 1, 128>}, {transform_indices = @transform_4, window_bounds = array<i64: 1, 128>}, {transform_indices = @transform_5, window_bounds = array<i64: 512, 128>}]} {
    %c0_i32 = arith.constant 0 : i32
    %0 = arith.cmpi eq, %arg2, %c0_i32 : i32
    %1 = arith.extui %0 : i1 to i32
    %c0_i32_0 = arith.constant 0 : i32
    %2 = arith.cmpi ne, %1, %c0_i32_0 : i32
    scf.if %2 {
      %cst_10 = arith.constant 0.000000e+00 : f32
      %12 = vector.broadcast %cst_10 : f32 to vector<512x128xf32>
      %c0_11 = arith.constant 0 : index
      %c0_12 = arith.constant 0 : index
      %13 = vector.load %arg9[%c0_11, %c0_12] : memref<512x128xf32, #tpu.memory_space<vmem>>, vector<512x128xf32>
      tpu.vector_store %arg9[%c0_11, %c0_12], %12 {strides = array<i32>} : memref<512x128xf32, #tpu.memory_space<vmem>>, vector<512x128xf32>,
    } else {
    }
    %c0 = arith.constant 0 : index
    %c0_1 = arith.constant 0 : index
    %3 = vector.load %arg9[%c0, %c0_1] : memref<512x128xf32, #tpu.memory_space<vmem>>, vector<512x128xf32>
    %c0_2 = arith.constant 0 : index
    %c0_3 = arith.constant 0 : index
    %4 = vector.load %arg3[%c0_2, %c0_3] : memref<512x128xbf16, #tpu.memory_space<vmem>>, vector<512x128xbf16>
    %c0_4 = arith.constant 0 : index
    %c0_5 = arith.constant 0 : index
    %5 = vector.load %arg4[%c0_4, %c0_5] : memref<128x128xbf16, #tpu.memory_space<vmem>>, vector<128x128xbf16>
    %cst = arith.constant dense<0.000000e+00> : vector<512x128xf32>
    %6 = tpu.matmul %4, %5, %cst {dimension_numbers = #tpu.dot_dimension_numbers<[1], [0], [0], [1], [0, 0, 1, 1], [], []>} : vector<512x128xbf16>, vector<128x128xbf16>, vector<512x128xf32> -> vector<512x128xf32>
    %7 = arith.addf %3, %6 : vector<512x128xf32>
    %c0_6 = arith.constant 0 : index
    %c0_7 = arith.constant 0 : index
    %8 = vector.load %arg9[%c0_6, %c0_7] : memref<512x128xf32, #tpu.memory_space<vmem>>, vector<512x128xf32>
    tpu.vector_store %arg9[%c0_6, %c0_7], %7 {strides = array<i32>} : memref<512x128xf32, #tpu.memory_space<vmem>>, vector<512x128xf32>,
    %c0_i32_8 = arith.constant 0 : i32
    %9 = arith.cmpi eq, %arg2, %c0_i32_8 : i32
    %10 = arith.extui %9 : i1 to i32
    %c0_i32_9 = arith.constant 0 : i32
    %11 = arith.cmpi ne, %10, %c0_i32_9 : i32
    scf.if %11 {
      %c0_10 = arith.constant 0 : index
      %c0_11 = arith.constant 0 : index
      %12 = vector.load %arg9[%c0_10, %c0_11] : memref<512x128xf32, #tpu.memory_space<vmem>>, vector<512x128xf32>
      %c0_12 = arith.constant 0 : index
      %c0_13 = arith.constant 0 : index
      %13 = vector.load %arg5[%c0_12, %c0_13] : memref<1x128xf32, #tpu.memory_space<vmem>>, vector<1x128xf32>
      %14 = vector.broadcast %13 : vector<1x128xf32> to vector<512x128xf32>
      %15 = arith.mulf %12, %14 : vector<512x128xf32>
      %c0_14 = arith.constant 0 : index
      %c0_15 = arith.constant 0 : index
      %16 = vector.load %arg6[%c0_14, %c0_15] : memref<1x128xf32, #tpu.memory_space<vmem>>, vector<1x128xf32>
      %17 = vector.broadcast %16 : vector<1x128xf32> to vector<512x128xf32>
      %18 = arith.addf %15, %17 : vector<512x128xf32>
      %cst_16 = arith.constant 0.000000e+00 : f32
      %19 = vector.broadcast %cst_16 : f32 to vector<512x128xf32>
      %20 = arith.maximumf %18, %19 : vector<512x128xf32>
      %c0_17 = arith.constant 0 : index
      %c0_18 = arith.constant 0 : index
      %21 = vector.load %arg7[%c0_17, %c0_18] : memref<1x128xf32, #tpu.memory_space<vmem>>, vector<1x128xf32>
      %cst_19 = arith.constant 0.000000e+00 : f32
      %22 = vector.broadcast %cst_19 : f32 to vector<512x128xf32>
      %23 = arith.minimumf %18, %22 : vector<512x128xf32>
      %24 = vector.broadcast %21 : vector<1x128xf32> to vector<512x128xf32>
      %25 = arith.mulf %24, %23 : vector<512x128xf32>
      %26 = arith.addf %20, %25 : vector<512x128xf32>
      %c0_20 = arith.constant 0 : index
      %c0_21 = arith.constant 0 : index
      %27 = vector.load %arg8[%c0_20, %c0_21] : memref<512x128xf32, #tpu.memory_space<vmem>>, vector<512x128xf32>
      tpu.vector_store %arg8[%c0_20, %c0_21], %26 {strides = array<i32>} : memref<512x128xf32, #tpu.memory_space<vmem>>, vector<512x128xf32>,
    } else {
    }
    return
  }
  func.func @transform_0(%arg0: i32, %arg1: i32, %arg2: i32) -> (i32, i32) {
    %c0_i32 = arith.constant 0 : i32
    return %arg0, %arg2 : i32, i32
  }
  func.func @transform_1(%arg0: i32, %arg1: i32, %arg2: i32) -> (i32, i32) {
    %c0_i32 = arith.constant 0 : i32
    return %arg2, %arg1 : i32, i32
  }
  func.func @transform_2(%arg0: i32, %arg1: i32, %arg2: i32) -> (i32, i32) {
    %c0_i32 = arith.constant 0 : i32
    %c0_i32_0 = arith.constant 0 : i32
    return %c0_i32, %arg1 : i32, i32
  }
  func.func @transform_3(%arg0: i32, %arg1: i32, %arg2: i32) -> (i32, i32) {
    %c0_i32 = arith.constant 0 : i32
    %c0_i32_0 = arith.constant 0 : i32
    return %c0_i32, %arg1 : i32, i32
  }
  func.func @transform_4(%arg0: i32, %arg1: i32, %arg2: i32) -> (i32, i32) {
    %c0_i32 = arith.constant 0 : i32
    %c0_i32_0 = arith.constant 0 : i32
    return %c0_i32, %arg1 : i32, i32
  }
  func.func @transform_5(%arg0: i32, %arg1: i32, %arg2: i32) -> (i32, i32) {
    %c0_i32 = arith.constant 0 : i32
    return %arg0, %arg1 : i32, i32
  }
}

</mosaic_0001>

<bundles_post_ra>
// kernel: tpu_custom_call.1
= control target key start
LH: loop header
LB: loop body
LE: loop exit
PB: predicated region body
PF: predicated region fallthrough
CT: control target
= control target key end

     0   :  { %s3107_s0 = inlined_call_operand.hbm [shape: bf16[90112,128], index: 0, kind: input, shape index: {}]   ;;  %s3108_s1 = inlined_call_operand.hbm [shape: bf16[128,128], index: 1, kind: input, shape index: {}]   ;;  %s3109_s2 = inlined_call_operand.hbm [shape: f32[1,128], index: 2, kind: input, shape index: {}]   ;;  %s3110_s3 = inlined_call_operand.hbm [shape: f32[1,128], index: 3, kind: input, shape index: {}]   ;;  %s3111_s4 = inlined_call_operand.hbm [shape: f32[1,128], index: 4, kind: input, shape index: {}]   ;;  %s3112_s5 = inlined_call_operand.hbm [shape: f32[90112,128], index: 5, kind: output, shape index: {}]  }
   0x1   :  { %3118 = sst [smem:[#allocation17_spill]] %s3108_s1 }
   0x2   :  { %10 = vsyncpa [#allocation4], 0 }
   0x3   :  { %12 = vsyncpa [#allocation4 + $0x1], 0 }
   0x4   :  { %13 = vsyncpa [#allocation7], 0 }
   0x5   :  { %14 = vsyncpa [#allocation10], 0 }
   0x6   :  { %15 = vsyncpa [#allocation5], 0 }
   0x7   :  { %17 = vsyncpa [#allocation5 + $0x1], 0  ;;  %s2524_s18 = smov 0   ;;  %s2526_s19 = smov 0  }
   0x8   :  { %s2528_s20 = smov 0   ;;  %s2530_s21 = smov 0  }
   0x9   :  { %s2532_s22 = smov 0   ;;  %s2534_s23 = smov 0  }
   0xa LB: > { %s1911_s24 = sadd.s32 4294967295, %s2482_s23   ;;  %s1912_s25 = sadd.s32 4294967294, %s2482_s23   ;;  %s2482_s23 = sphi %s2534_s23, %s23_s23   ;;  %s2478_s22 = sphi %s2532_s22, %s3137_s22   ;;  %s2474_s21 = sphi %s2530_s21, %s3136_s21   ;;  %s2470_s20 = sphi %s2528_s20, %s3135_s20   ;;  %s2466_s19 = sphi %s2526_s19, %s3134_s19   ;;  %s2462_s18 = sphi %s2524_s18, %s3133_s18  }
   0xb   : > { %p64_p0 = scmp.ne.s32.totalorder %s2466_s19, %s2462_s18  ;;  %p2558_p1 = scmp.eq.s32.totalorder %s1911_s24, 0 }
   0xc   : > { %p2562_p2 = scmp.eq.s32.totalorder %s1911_s24, 175  ;;  %p202_p3 = scmp.eq.s32.totalorder %s1912_s25, 175 }
   0xd   : > { %s3119_s26 = scalar_select %p2558_p1, 1, 0 }
   0xe   : > { %p2568_p4 = por %p2558_p1, %p64_p0  ;;  %p1913_p5 = scmp.ge.s32.totalorder %s2482_s23, 1 }
   0xf   : > { %p2573_p6 = por %p202_p3, %p64_p0  ;;  %p209_p7 = scmp.lt.s32.totalorder %s2482_s23, 177 }
  0x10   : > { %s3121_s28 = scalar_select %p2568_p4, 1, 0 }
  0x11   : > { %s3122_s29 = scalar_select %p2573_p6, 1, 0 }
  0x12   : > { %p2578_p8 = pnand %p1913_p5, %p209_p7  ;;  %s2484_s6 = smov [#allocation6]  }
  0x13   : > { %s225_s7 = sshll.u32 %s2484_s6, 4  ;;  %s2485_s9 = smov [#allocation9]   ;;  %s226_s7 = int_to_ptr.vmem [resolvable:$true] %s225_s7 }
  0x14   : > { %p2135_p9 = pneg %p2578_p8  ;;  %s254_s10 = sshll.u32 %s2485_s9, 4  ;;  %s255_s10 = int_to_ptr.vmem [resolvable:$true] %s254_s10 }
  0x15   : > { %s2486_s11 = smov [#allocation8]   ;;  %s2273_s13 = scalar_lea.vmem %s226_s7, 1024 }
  0x16   : > { %p2586_p10 = pnand %p2135_p9, %p2558_p1  ;;  %s241_s12 = sshll.u32 %s2486_s11, 4  ;;  %s242_s12 = int_to_ptr.vmem [resolvable:$true] %s241_s12 }
  0x17   : > { %p2274_p12 = scmp.ne.s32.totalorder %s226_s7, %s2273_s13  ;;  %p2281_p3 = scmp.lt.s32.totalorder %s226_s7, %s226_s7 }
  0x18   : > { %p2264_p11 = pneg %p2586_p10  ;;  %p2282_p5 = scmp.lt.s32.totalorder %s2273_s13, %s2273_s13 }
  0x1a   : > { %p2276_p13 = pnand %p2274_p12, %p2264_p11  ;;  %p2283_p7 = por %p2282_p5, %p2281_p3 }
  0x1c   : > { %p2277_p0 = pneg %p2276_p13 }
  0x1e   : > { %p2284_p9 = pnand %p2283_p7, %p2277_p0 }
  0x20   : > { %2287 = shalt.err (!%p2284_p9)
}
  0x21   : > { %s3116_s14 = smov 64   ;;  %s3117_s15 = smov 4  }
  0x22   : > { %s3125_s1 = sld [smem:[#allocation17_spill]]  ;;  %s2299_s24 = scalar_lea.vmem %s255_s10, 16 }
  0x23   : > { %p2300_p12 = scmp.ne.s32.totalorder %s255_s10, %s2299_s24  ;;  %s2306_s25 = scalar_lea.vmem %s255_s10, 32 }
  0x24   : > { %p2307_p0 = scmp.lt.s32.totalorder %s255_s10, %s255_s10  ;;  %p2308_p5 = scmp.lt.s32.totalorder %s2306_s25, %s2299_s24 }
  0x25   : > { %p2302_p13 = pnand %p2300_p12, %p2264_p11 }
  0x26   : > { %p2309_p7 = por %p2308_p5, %p2307_p0 }
  0x27   : > { %p2303_p3 = pneg %p2302_p13 }
  0x28   : > { %2138 = dma.hbm_to_vmem [thread:$0]  (!%p2586_p10), %s3125_s1, 1024, %s226_s7, [#allocation7], %s3116_s14, %s3116_s14, %s3117_s15  }
  0x29   : > { %p2310_p9 = pnand %p2309_p7, %p2303_p3 }
  0x2b   : > { %2313 = shalt.err (!%p2310_p9)
}
  0x2c   : > { %2144 = dma.hbm_to_vmem [thread:$0]  (!%p2586_p10), %s3110_s3, 16, %s255_s10, [#allocation10]  }
  0x2d   : > { %s2325_s7 = scalar_lea.vmem %s242_s12, 16  ;;  %s2332_s11 = scalar_lea.vmem %s242_s12, 32 }
  0x2e   : > { %p2326_p6 = scmp.ne.s32.totalorder %s242_s12, %s2325_s7  ;;  %p2333_p1 = scmp.lt.s32.totalorder %s242_s12, %s242_s12 }
  0x2f   : > { %p2334_p4 = scmp.lt.s32.totalorder %s2332_s11, %s2325_s7 }
  0x30   : > { %p2328_p12 = pnand %p2326_p6, %p2264_p11 }
  0x31   : > { %p2335_p0 = por %p2334_p4, %p2333_p1 }
  0x32   : > { %p2329_p13 = pneg %p2328_p12 }
  0x34   : > { %p2336_p3 = pnand %p2335_p0, %p2329_p13 }
  0x36   : > { %2339 = shalt.err (!%p2336_p3)
}
  0x37   : > { %2141 = dma.hbm_to_vmem [thread:$0]  (!%p2586_p10), %s3109_s2, 16, %s242_s12, [#allocation7]  }
  0x38   : > { %s2489_s10 = smov [#allocation11]  }
  0x39   : > { %s267_s17 = sshll.u32 %s2489_s10, 4  ;;  %s268_s17 = int_to_ptr.vmem [resolvable:$true] %s267_s17 }
  0x3a   : > { %s2351_s24 = scalar_lea.vmem %s268_s17, 16  ;;  %s2358_s25 = scalar_lea.vmem %s268_s17, 32 }
  0x3b   : > { %p2352_p5 = scmp.ne.s32.totalorder %s268_s17, %s2351_s24  ;;  %p2359_p1 = scmp.lt.s32.totalorder %s268_s17, %s268_s17 }
  0x3c   : > { %p2360_p4 = scmp.lt.s32.totalorder %s2358_s25, %s2351_s24 }
  0x3d   : > { %p2354_p6 = pnand %p2352_p5, %p2264_p11 }
  0x3e   : > { %p2361_p9 = por %p2360_p4, %p2359_p1 }
  0x3f   : > { %p2355_p7 = pneg %p2354_p6 }
  0x41   : > { %p2362_p12 = pnand %p2361_p9, %p2355_p7 }
  0x43   : > { %2365 = shalt.err (!%p2362_p12)
}
  0x44   : > { %2147 = dma.hbm_to_vmem [thread:$0]  (!%p2586_p10), %s3111_s4, 16, %s268_s17, [#allocation10]  }
  0x45   : > { %s42_s12 = sadd.s32 1, %s2478_s22  ;;  %s51_s7 = sadd.s32 1, %s2470_s20 }
  0x46   : > { %p44_p11 = scmp.ge.s32.totalorder %s42_s12, 176  ;;  %p58_p13 = scmp.ne.s32.totalorder %s2470_s20, %s2466_s19 }
  0x47   : > { %p59_p0 = scmp.eq.s32.totalorder %s2482_s23, 0  ;;  %p2160_p3 = scmp.lt.s32.totalorder %s2482_s23, 176 }
  0x48   : > { %s3139_s12 = smov (%p44_p11, %s42_s12), 0  ;;  %p2637_p6 = por %p2562_p2, %p58_p13 }
  0x49   : > { %p60_p5 = por %p59_p0, %p58_p13  ;;  %s46_s11 = ssub.s32 %s2478_s22, %s3139_s12 }
  0x4a   : > { %s278_s13 = sand.u32 1, %s2470_s20   ;;  %p49_p7 = scmp.eq.s32.totalorder %s46_s11, 0 }
  0x4b   : > { %s1919_s16 = sshll.u32 %s278_s13, 8  ;;  %s1977_s10 = sshll.u32 %s2478_s22, 12 }
  0x4c   : > { %s2646_s17 = scalar_select %p49_p7, %s2470_s20, %s51_s7  }
  0x4d   : > { %s289_s6 = scalar_lea.hbm %s3107_s0, %s1977_s10  ;;  %s282_s9 = scalar_lea.vmem [#allocation3], %s1919_s16 }
  0x4e   : > { %s290_s14 = sshll.u32 %s282_s9, 4  ;;  %p2653_p10 = pnand %p2160_p3, %p60_p5  ;;  %s291_s14 = int_to_ptr.vmem [resolvable:$true] %s290_s14 }
  0x4f   : > { %s279_s15 = scalar_lea.sflag [#allocation4], %s278_s13  ;;  %s2379_s11 = scalar_lea.vmem %s291_s14, 4096 }
  0x50   : > { %p2368_p2 = pneg %p2653_p10  ;;  %p2380_p1 = scmp.ne.s32.totalorder %s291_s14, %s2379_s11 }
  0x51   : > { %s2490_s7 = smov [#allocation3]  }
  0x52   : > { %p2382_p4 = pnand %p2380_p1, %p2368_p2  ;;  %s2384_s1 = sshll.u32 %s2490_s7, 4  ;;  %s2385_s1 = int_to_ptr.vmem [resolvable:$false] %s2384_s1 }
  0x53   : > { %s2386_s10 = scalar_lea.vmem %s2385_s1, 8192  ;;  %p2387_p12 = scmp.lt.s32.totalorder %s291_s14, %s2385_s1 }
  0x54   : > { %p2383_p9 = pneg %p2382_p4  ;;  %p2388_p11 = scmp.lt.s32.totalorder %s2386_s10, %s2379_s11 }
  0x56   : > { %p2389_p13 = por %p2388_p11, %p2387_p12 }
  0x58   : > { %p2390_p0 = pnand %p2389_p13, %p2383_p9 }
  0x5a   : > { %2393 = shalt.err (!%p2390_p0)
}
  0x5b   : > { %s3128_s16 = smov 4   ;;  %s3129_s24 = smov 64  }
  0x5c   : > { %2151 = dma.hbm_to_vmem [thread:$0]  (!%p2653_p10), %s289_s6, 4096, %s291_s14, %s279_s15, %s3129_s24, %s3129_s24, %s3128_s16  }
  0x5d   : > { %302 = sbr.rel (%p2578_p8) target bundleno = 450 (0x1c2), region = 40  ;;  %s2667_s13 = sand.u32 (!%p2578_p8), 1, %s2466_s19  }
  0x5e   : > { %s1923_s1 = sshll.u32 (!%p2578_p8), %s2667_s13, 8  ;;  %s305_s25 = scalar_lea.sflag (!%p2578_p8), [#allocation4], %s2667_s13 }
  0x5f   : > { %s2671_s9 = scalar_lea.vmem (!%p2578_p8), [#allocation3], %s1923_s1  ;;  %p3130_p3 = scmp.ne.s32.totalorder (!%p2578_p8), %s3121_s28, 0 }
  0x62   : > { %2445 = dma.done.wait (%p3130_p3), %s305_s25, 4096  }
  0x63   : > { %2447 = vsyncadd (%p3130_p3), %s305_s25, 4294963200  ;;  %p3131_p5 = scmp.ne.s32.totalorder %s3119_s26, 0 }
  0x65   : > { %2449 = dma.done.wait (%p3131_p5), [#allocation7], 1040  }
  0x66   : > { %2451 = vsyncadd (%p3131_p5), [#allocation7], 4294966256 }
  0x67   : > { %2453 = dma.done.wait (%p3131_p5), [#allocation10], 32  }
  0x68   : > { %2455 = vsyncadd (%p3131_p5), [#allocation10], 4294967264  ;;  %v2222_v0 = vld [vmem:[#allocation6 + $0x38] sm:$0xff]   ;;  %v2223_v1 = vld [vmem:[#allocation6 + $0x30] sm:$0xff]   ;;  %s1928_s26 = sshll.u32 %s2667_s13, 9  ;;  %s1978_s30 = sshll.u32 %s2474_s21, 13 }
  0x69   : > { %2019 = vmatprep.subr.bf16.mxu0 %v2222_v0  ;;  %2099 = vmatprep.subr.bf16.mxu1 %v2222_v0  ;;  %v2224_v2 = vld [vmem:[#allocation6 + $0x28] sm:$0xff]   ;;  %v2225_v3 = vld [vmem:[#allocation6 + $0x20] sm:$0xff]   ;;  %v2226_v6 = vld [vmem:[#allocation6 + $0x18] sm:$0xff]   ;;  %s2746_s28 = scalar_lea.vmem [#allocation12], %s1928_s26  ;;  %s3057_s27 = scalar_lea.hbm %s3112_s5, %s1978_s30 }
  0x6a   : > { %2020 = vmatpush3.bf16.msra.mxu0 %v2222_v0  ;;  %2107 = vmatpush3.bf16.msra.mxu1 %v2222_v0  ;;  %v2230_v4 = vld [vmem:[%s2671_s9] sm:$0xff]   ;;  %v2227_v7 = vld [vmem:[#allocation6 + $0x10] sm:$0xff]   ;;  %v2228_v8 = vld [vmem:[#allocation6 + $0x8] sm:$0xff]   ;;  %s1775_s14 = sshll.u32 %s2746_s28, 4  ;;  %s1761_s21 = scalar_lea.sflag [#allocation5], %s2667_s13  ;;  %s3059_s14 = int_to_ptr.vmem [resolvable:$true] %s1775_s14 }
  0x6b   : > { %2021 = vmatprep.subr.bf16.mxu0 %v2223_v1  ;;  %2100 = vmatprep.subr.bf16.mxu1 %v2223_v1  ;;  %v2231_v5 = vld [vmem:[%s2671_s9 + $0x80] sm:$0xff]   ;;  %v2232_v10 = vld [vmem:[%s2671_s9 + $0x8] sm:$0xff]   ;;  %v2234_v12 = vld [vmem:[%s2671_s9 + $0x10] sm:$0xff]   ;;  %s2394_s11 = scalar_lea.vmem %s3059_s14, 8192  ;;  %s2491_s7 = smov [#allocation12]  }
  0x6c   : > { %2035 = vmatprep.mubr.bf16.mxu0 %v2230_v4  ;;  %2067 = vmatprep.mubr.bf16.mxu1 %v2231_v5  ;;  %v2229_v9 = vld [vmem:[#allocation6] sm:$0xff]   ;;  %v2233_v11 = vld [vmem:[%s2671_s9 + $0x88] sm:$0xff]   ;;  %v2235_v13 = vld [vmem:[%s2671_s9 + $0x90] sm:$0xff]   ;;  %p2395_p8 = scmp.ne.s32.totalorder %s3059_s14, %s2394_s11  ;;  %s2398_s10 = sshll.u32 %s2491_s7, 4  ;;  %s2399_s10 = int_to_ptr.vmem [resolvable:$false] %s2398_s10 }
  0x6d   : > { %v2236_v14 = vld [vmem:[%s2671_s9 + $0x18] sm:$0xff]   ;;  %v2238_v16 = vld [vmem:[%s2671_s9 + $0x20] sm:$0xff]   ;;  %v2240_v18 = vld [vmem:[%s2671_s9 + $0x28] sm:$0xff]   ;;  %s2400_s16 = scalar_lea.vmem %s2399_s10, 16384  ;;  %p2401_p2 = scmp.lt.s32.totalorder %s3059_s14, %s2399_s10 }
  0x6e   : > { %2022 = vmatpush3.bf16.msra.mxu0 %v2223_v1  ;;  %2108 = vmatpush3.bf16.msra.mxu1 %v2223_v1  ;;  %v2237_v15 = vld [vmem:[%s2671_s9 + $0x98] sm:$0xff]   ;;  %v2239_v17 = vld [vmem:[%s2671_s9 + $0xa0] sm:$0xff]   ;;  %v2241_v19 = vld [vmem:[%s2671_s9 + $0xa8] sm:$0xff]   ;;  %p2396_p7 = pnand %p2395_p8, %p2637_p6  ;;  %p2402_p1 = scmp.lt.s32.totalorder %s2400_s16, %s2394_s11 }
  0x6f   : > { %2023 = vmatprep.subr.bf16.mxu0 %v2224_v2  ;;  %2101 = vmatprep.subr.bf16.mxu1 %v2224_v2  ;;  %v2242_v20 = vld [vmem:[%s2671_s9 + $0x30] sm:$0xff]   ;;  %v2244_v22 = vld [vmem:[%s2671_s9 + $0x38] sm:$0xff]   ;;  %v2246_v24 = vld [vmem:[%s2671_s9 + $0x40] sm:$0xff]  }
  0x70   : > { %v2243_v21 = vld [vmem:[%s2671_s9 + $0xb0] sm:$0xff]   ;;  %v2245_v23 = vld [vmem:[%s2671_s9 + $0xb8] sm:$0xff]   ;;  %v2247_v25 = vld [vmem:[%s2671_s9 + $0xc0] sm:$0xff]   ;;  %p2397_p10 = pneg %p2396_p7  ;;  %p2403_p4 = por %p2402_p1, %p2401_p2 }
  0x71   : > { %v2248_v26 = vld [vmem:[%s2671_s9 + $0x48] sm:$0xff]   ;;  %v2250_v28 = vld [vmem:[%s2671_s9 + $0x50] sm:$0xff]   ;;  %v2252_v30 = vld [vmem:[%s2671_s9 + $0x58] sm:$0xff]  }
  0x72   : > { %2024 = vmatpush3.bf16.msra.mxu0 %v2224_v2  ;;  %2109 = vmatpush3.bf16.msra.mxu1 %v2224_v2  ;;  %v2249_v27 = vld [vmem:[%s2671_s9 + $0xc8] sm:$0xff]   ;;  %v2251_v29 = vld [vmem:[%s2671_s9 + $0xd0] sm:$0xff]   ;;  %v2253_v31 = vld [vmem:[%s2671_s9 + $0xd8] sm:$0xff]   ;;  %p2404_p9 = pnand %p2403_p4, %p2397_p10 }
  0x73   : > { %2025 = vmatprep.subr.bf16.mxu0 %v2225_v3  ;;  %2102 = vmatprep.subr.bf16.mxu1 %v2225_v3  ;;  %v2254_v32 = vld [vmem:[%s2671_s9 + $0x60] sm:$0xff]   ;;  %v2256_v34 = vld [vmem:[%s2671_s9 + $0x68] sm:$0xff]   ;;  %v2258_v36 = vld [vmem:[%s2671_s9 + $0x70] sm:$0xff]  }
  0x74   : > { %v2255_v33 = vld [vmem:[%s2671_s9 + $0xe0] sm:$0xff]   ;;  %v2257_v35 = vld [vmem:[%s2671_s9 + $0xe8] sm:$0xff]   ;;  %v2259_v37 = vld [vmem:[%s2671_s9 + $0xf0] sm:$0xff]  }
  0x75   : > { %v2260_v38 = vld [vmem:[%s2671_s9 + $0x78] sm:$0xff]   ;;  %v2717_v40 = vld [vmem:[#allocation8] ss:$0 sm:$0xff]  ;;  %v2719_v42 = vld [vmem:[#allocation9] ss:$0 sm:$0xff] }
  0x76   : > { %2026 = vmatpush3.bf16.msra.mxu0 %v2225_v3  ;;  %2110 = vmatpush3.bf16.msra.mxu1 %v2225_v3  ;;  %v2261_v39 = vld [vmem:[%s2671_s9 + $0xf8] sm:$0xff]   ;;  %v2727_v52 = vld [vmem:[#allocation11] ss:$0 sm:$0xff] }
  0x77   : > { %2027 = vmatprep.subr.bf16.mxu0 %v2226_v6  ;;  %2103 = vmatprep.subr.bf16.mxu1 %v2226_v6 }
  0x7a   : > { %2028 = vmatpush3.bf16.msra.mxu0 %v2226_v6  ;;  %2111 = vmatpush3.bf16.msra.mxu1 %v2226_v6 }
  0x7b   : > { %2029 = vmatprep.subr.bf16.mxu0 %v2227_v7  ;;  %2104 = vmatprep.subr.bf16.mxu1 %v2227_v7 }
  0x7e   : > { %2030 = vmatpush3.bf16.msra.mxu0 %v2227_v7  ;;  %2112 = vmatpush3.bf16.msra.mxu1 %v2227_v7 }
  0x7f   : > { %2031 = vmatprep.subr.bf16.mxu0 %v2228_v8  ;;  %2105 = vmatprep.subr.bf16.mxu1 %v2228_v8 }
  0x82   : > { %2032 = vmatpush3.bf16.msra.mxu0 %v2228_v8  ;;  %2113 = vmatpush3.bf16.msra.mxu1 %v2228_v8 }
  0x83   : > { %2033 = vmatprep.subr.bf16.mxu0 %v2229_v9  ;;  %2106 = vmatprep.subr.bf16.mxu1 %v2229_v9 }
  0x86   : > { %2034 = vmatpush3.bf16.msra.mxu0 %v2229_v9  ;;  %2114 = vmatpush3.bf16.msra.mxu1 %v2229_v9 }
  0x89   : > { %2036 = vmatmul.mubr.bf16.vlgmr.msra.gmra.mxu0 %v2232_v10  ;;  %2068 = vmatmul.mubr.bf16.vlgmr.msra.gmra.mxu1 %v2233_v11 }
  0x8a   : > { %2039 = vmatprep.mubr.bf16.mxu0 %v2234_v12  ;;  %2071 = vmatprep.mubr.bf16.mxu1 %v2235_v13 }
  0x91   : > { %2040 = vmatmul.mubr.bf16.gmra.mxu0 %v2236_v14  ;;  %2072 = vmatmul.mubr.bf16.gmra.mxu1 %v2237_v15 }
  0x92   : > { %2043 = vmatprep.mubr.bf16.mxu0 %v2238_v16  ;;  %2075 = vmatprep.mubr.bf16.mxu1 %v2239_v17 }
  0x99   : > { %2044 = vmatmul.mubr.bf16.gmra.mxu0 %v2240_v18  ;;  %2076 = vmatmul.mubr.bf16.gmra.mxu1 %v2241_v19 }
  0x9a   : > { %2047 = vmatprep.mubr.bf16.mxu0 %v2242_v20  ;;  %2079 = vmatprep.mubr.bf16.mxu1 %v2243_v21 }
  0xa1   : > { %2048 = vmatmul.mubr.bf16.gmra.mxu0 %v2244_v22  ;;  %2080 = vmatmul.mubr.bf16.gmra.mxu1 %v2245_v23 }
  0xa2   : > { %2051 = vmatprep.mubr.bf16.mxu0 %v2246_v24  ;;  %2083 = vmatprep.mubr.bf16.mxu1 %v2247_v25 }
  0xa9   : > { %2052 = vmatmul.mubr.bf16.gmra.mxu0 %v2248_v26  ;;  %2084 = vmatmul.mubr.bf16.gmra.mxu1 %v2249_v27 }
  0xaa   : > { %2055 = vmatprep.mubr.bf16.mxu0 %v2250_v28  ;;  %2087 = vmatprep.mubr.bf16.mxu1 %v2251_v29 }
  0xb1   : > { %2056 = vmatmul.mubr.bf16.gmra.mxu0 %v2252_v30  ;;  %2088 = vmatmul.mubr.bf16.gmra.mxu1 %v2253_v31 }
  0xb2   : > { %2059 = vmatprep.mubr.bf16.mxu0 %v2254_v32  ;;  %2091 = vmatprep.mubr.bf16.mxu1 %v2255_v33 }
  0xb9   : > { %2060 = vmatmul.mubr.bf16.gmra.mxu0 %v2256_v34  ;;  %2092 = vmatmul.mubr.bf16.gmra.mxu1 %v2257_v35 }
  0xba   : > { %2063 = vmatprep.mubr.bf16.mxu0 %v2258_v36  ;;  %2095 = vmatprep.mubr.bf16.mxu1 %v2259_v37 }
  0xc1   : > { %2064 = vmatmul.mubr.bf16.gmra.mxu0 %v2260_v38  ;;  %2096 = vmatmul.mubr.bf16.gmra.mxu1 %v2261_v39 }
 0x149   : > { %v2037_v41 = vpop.f32.mrf.mxu0  ;;  %v2069_v43 = vpop.f32.mrf.mxu1 }
 0x14a   : > { %v1300_v44 = vmul.f32 %v2037_v41, %v2717_v40  ;;  %v1332_v45 = vmul.f32 %v2069_v43, %v2717_v40 }
 0x14b   : > { %v841_v46 = vpop.f32.mrf.mxu0  ;;  %v969_v47 = vpop.f32.mrf.mxu1 }
 0x14c   : > { %v1371_v48 = vadd.f32 %v2719_v42, %v1300_v44  ;;  %v1403_v49 = vadd.f32 %v2719_v42, %v1332_v45  ;;  %v1298_v50 = vmul.f32 %v2717_v40, %v841_v46  ;;  %v1330_v51 = vmul.f32 %v2717_v40, %v969_v47 }
 0x14d   : > { %v2038_v53 = vpop.f32.mrf.mxu0  ;;  %v2070_v54 = vpop.f32.mrf.mxu1 }
 0x14e   : > { %v1435_v55 = vmax.f32 %v1371_v48, 0.0  ;;  %v1500_v56 = vmin.f32 %v1371_v48, 0.0  ;;  %v1467_v57 = vmax.f32 %v1403_v49, 0.0  ;;  %v1532_v58 = vmin.f32 %v1403_v49, 0.0 }
 0x14f   : > { %v1369_v59 = vadd.f32 %v2719_v42, %v1298_v50  ;;  %v1401_v60 = vadd.f32 %v2719_v42, %v1330_v51  ;;  %v1301_v61 = vmul.f32 %v2038_v53, %v2717_v40  ;;  %v1333_v62 = vmul.f32 %v2070_v54, %v2717_v40  ;;  %v844_v63 = vpop.f32.mrf.mxu0  ;;  %v972_v0 = vpop.f32.mrf.mxu1 }
 0x150   : > { %v1570_v1 = vmul.f32 %v2727_v52, %v1500_v56  ;;  %v1602_v2 = vmul.f32 %v2727_v52, %v1532_v58  ;;  %v1299_v3 = vmul.f32 %v2717_v40, %v844_v63  ;;  %v1331_v4 = vmul.f32 %v2717_v40, %v972_v0 }
 0x151   : > { %v1433_v5 = vmax.f32 %v1369_v59, 0.0  ;;  %v1498_v6 = vmin.f32 %v1369_v59, 0.0  ;;  %v1465_v7 = vmax.f32 %v1401_v60, 0.0  ;;  %v1530_v8 = vmin.f32 %v1401_v60, 0.0  ;;  %v2041_v9 = vpop.f32.mrf.mxu0  ;;  %v2073_v10 = vpop.f32.mrf.mxu1 }
 0x152   : > { %v1634_v11 = vadd.f32 %v1570_v1, %v1435_v55  ;;  %v1666_v12 = vadd.f32 %v1602_v2, %v1467_v57  ;;  %v1372_v13 = vadd.f32 %v2719_v42, %v1301_v61  ;;  %v1404_v14 = vadd.f32 %v2719_v42, %v1333_v62 }
 0x153   : > { %v1568_v15 = vmul.f32 %v2727_v52, %v1498_v6  ;;  %v1600_v16 = vmul.f32 %v2727_v52, %v1530_v8  ;;  %v1370_v17 = vadd.f32 %v2719_v42, %v1299_v3  ;;  %v1402_v18 = vadd.f32 %v2719_v42, %v1331_v4  ;;  %v857_v19 = vpop.f32.mrf.mxu0  ;;  %v985_v20 = vpop.f32.mrf.mxu1 }
 0x154   : > { %1698 = vst [vmem:[%s2746_s28 + $0x10] sm:$0xff] %v1634_v11  ;;  %1730 = vst [vmem:[%s2746_s28 + $0x110] sm:$0xff] %v1666_v12  ;;  %v1436_v21 = vmax.f32 %v1372_v13, 0.0  ;;  %v1501_v22 = vmin.f32 %v1372_v13, 0.0  ;;  %v1468_v23 = vmax.f32 %v1404_v14, 0.0  ;;  %v1533_v24 = vmin.f32 %v1404_v14, 0.0 }
 0x155   : > { %v1632_v25 = vadd.f32 %v1568_v15, %v1433_v5  ;;  %v1664_v26 = vadd.f32 %v1600_v16, %v1465_v7  ;;  %v1434_v27 = vmax.f32 %v1370_v17, 0.0  ;;  %v1499_v28 = vmin.f32 %v1370_v17, 0.0  ;;  %v2042_v29 = vpop.f32.mrf.mxu0  ;;  %v2074_v30 = vpop.f32.mrf.mxu1 }
 0x156   : > { %v1571_v31 = vmul.f32 %v2727_v52, %v1501_v22  ;;  %v1603_v32 = vmul.f32 %v2727_v52, %v1533_v24  ;;  %v1466_v33 = vmax.f32 %v1402_v18, 0.0  ;;  %v1531_v34 = vmin.f32 %v1402_v18, 0.0 }
 0x157   : > { %1696 = vst [vmem:[%s2746_s28] sm:$0xff] %v1632_v25  ;;  %1728 = vst [vmem:[%s2746_s28 + $0x100] sm:$0xff] %v1664_v26  ;;  %v1569_v35 = vmul.f32 %v2727_v52, %v1499_v28  ;;  %v1304_v36 = vmul.f32 %v2041_v9, %v2717_v40  ;;  %v1336_v37 = vmul.f32 %v2073_v10, %v2717_v40  ;;  %v860_v39 = vpop.f32.mrf.mxu0  ;;  %v988_v41 = vpop.f32.mrf.mxu1 }
 0x158   : > { %v1302_v38 = vmul.f32 %v2717_v40, %v857_v19  ;;  %v1635_v43 = vadd.f32 %v1571_v31, %v1436_v21  ;;  %v1667_v44 = vadd.f32 %v1603_v32, %v1468_v23  ;;  %v1601_v45 = vmul.f32 %v2727_v52, %v1531_v34 }
 0x159   : > { %v1334_v46 = vmul.f32 %v2717_v40, %v985_v20  ;;  %v1633_v47 = vadd.f32 %v1569_v35, %v1434_v27  ;;  %v1375_v48 = vadd.f32 %v2719_v42, %v1304_v36  ;;  %v1407_v49 = vadd.f32 %v2719_v42, %v1336_v37  ;;  %v2045_v51 = vpop.f32.mrf.mxu0  ;;  %v2077_v53 = vpop.f32.mrf.mxu1 }
 0x15a   : > { %v1373_v50 = vadd.f32 %v2719_v42, %v1302_v38  ;;  %1699 = vst [vmem:[%s2746_s28 + $0x18] sm:$0xff] %v1635_v43  ;;  %1731 = vst [vmem:[%s2746_s28 + $0x118] sm:$0xff] %v1667_v44  ;;  %v1665_v54 = vadd.f32 %v1601_v45, %v1466_v33  ;;  %v1305_v56 = vmul.f32 %v2042_v29, %v2717_v40 }
 0x15b   : > { %v1405_v55 = vadd.f32 %v2719_v42, %v1334_v46  ;;  %v1337_v57 = vmul.f32 %v2074_v30, %v2717_v40  ;;  %1697 = vst [vmem:[%s2746_s28 + $0x8] sm:$0xff] %v1633_v47  ;;  %v1439_v58 = vmax.f32 %v1375_v48, 0.0  ;;  %v1504_v59 = vmin.f32 %v1375_v48, 0.0  ;;  %v873_v62 = vpop.f32.mrf.mxu0  ;;  %v1001_v63 = vpop.f32.mrf.mxu1 }
 0x15c   : > { %v1471_v60 = vmax.f32 %v1407_v49, 0.0  ;;  %v1536_v61 = vmin.f32 %v1407_v49, 0.0  ;;  %1729 = vst [vmem:[%s2746_s28 + $0x108] sm:$0xff] %v1665_v54  ;;  %v1437_v0 = vmax.f32 %v1373_v50, 0.0  ;;  %v1502_v1 = vmin.f32 %v1373_v50, 0.0 }
 0x15d   : > { %v1469_v2 = vmax.f32 %v1405_v55, 0.0  ;;  %v1534_v3 = vmin.f32 %v1405_v55, 0.0  ;;  %v1574_v4 = vmul.f32 %v2727_v52, %v1504_v59  ;;  %v1376_v6 = vadd.f32 %v2719_v42, %v1305_v56  ;;  %v2046_v8 = vpop.f32.mrf.mxu0  ;;  %v2774_v9 = vpop.f32.mrf.mxu1 }
 0x15e   : > { %v1606_v5 = vmul.f32 %v2727_v52, %v1536_v61  ;;  %v1408_v7 = vadd.f32 %v2719_v42, %v1337_v57  ;;  %v1572_v10 = vmul.f32 %v2727_v52, %v1502_v1  ;;  %v1303_v12 = vmul.f32 %v2717_v40, %v860_v39 }
 0x15f   : > { %v1604_v11 = vmul.f32 %v2727_v52, %v1534_v3  ;;  %v1335_v13 = vmul.f32 %v2717_v40, %v988_v41  ;;  %v1638_v14 = vadd.f32 %v1574_v4, %v1439_v58  ;;  %v1440_v16 = vmax.f32 %v1376_v6, 0.0  ;;  %v876_v18 = vpop.f32.mrf.mxu0  ;;  %v1004_v19 = vpop.f32.mrf.mxu1 }
 0x160   : > { %v1670_v15 = vadd.f32 %v1606_v5, %v1471_v60  ;;  %v1505_v17 = vmin.f32 %v1376_v6, 0.0  ;;  %v1636_v20 = vadd.f32 %v1572_v10, %v1437_v0  ;;  %v1472_v22 = vmax.f32 %v1408_v7, 0.0 }
 0x161   : > { %v1668_v21 = vadd.f32 %v1604_v11, %v1469_v2  ;;  %v1537_v23 = vmin.f32 %v1408_v7, 0.0  ;;  %1702 = vst [vmem:[%s2746_s28 + $0x30] sm:$0xff] %v1638_v14  ;;  %v1374_v25 = vadd.f32 %v2719_v42, %v1303_v12  ;;  %v1406_v26 = vadd.f32 %v2719_v42, %v1335_v13  ;;  %v2786_v28 = vpop.f32.mrf.mxu0  ;;  %v2788_v29 = vpop.f32.mrf.mxu1 }
 0x162   : > { %1734 = vst [vmem:[%s2746_s28 + $0x130] sm:$0xff] %v1670_v15  ;;  %v1575_v24 = vmul.f32 %v2727_v52, %v1505_v17  ;;  %v1308_v27 = vmul.f32 %v2045_v51, %v2717_v40  ;;  %1700 = vst [vmem:[%s2746_s28 + $0x20] sm:$0xff] %v1636_v20  ;;  %v1340_v31 = vmul.f32 %v2077_v53, %v2717_v40 }
 0x163   : > { %1732 = vst [vmem:[%s2746_s28 + $0x120] sm:$0xff] %v1668_v21  ;;  %v1607_v30 = vmul.f32 %v2727_v52, %v1537_v23  ;;  %v1306_v32 = vmul.f32 %v2717_v40, %v873_v62  ;;  %v1338_v33 = vmul.f32 %v2717_v40, %v1001_v63  ;;  %v1438_v35 = vmax.f32 %v1374_v25, 0.0  ;;  %v889_v38 = vpop.f32.mrf.mxu0  ;;  %v2796_v39 = vpop.f32.mrf.mxu1 }
 0x164   : > { %v1639_v34 = vadd.f32 %v1575_v24, %v1440_v16  ;;  %v1503_v36 = vmin.f32 %v1374_v25, 0.0  ;;  %v1470_v37 = vmax.f32 %v1406_v26, 0.0  ;;  %v1535_v43 = vmin.f32 %v1406_v26, 0.0 }
 0x165   : > { %v1671_v41 = vadd.f32 %v1607_v30, %v1472_v22  ;;  %v1379_v44 = vadd.f32 %v2719_v42, %v1308_v27  ;;  %v1411_v45 = vadd.f32 %v2719_v42, %v1340_v31  ;;  %v1377_v47 = vadd.f32 %v2719_v42, %v1306_v32  ;;  %v2805_v50 = vpop.f32.mrf.mxu0  ;;  %v2807_v51 = vpop.f32.mrf.mxu1 }
 0x166   : > { %1703 = vst [vmem:[%s2746_s28 + $0x38] sm:$0xff] %v1639_v34  ;;  %v1573_v46 = vmul.f32 %v2727_v52, %v1503_v36  ;;  %v1409_v48 = vadd.f32 %v2719_v42, %v1338_v33  ;;  %v1309_v49 = vmul.f32 %v2046_v8, %v2717_v40  ;;  %v1605_v53 = vmul.f32 %v2727_v52, %v1535_v43 }
 0x167   : > { %1735 = vst [vmem:[%s2746_s28 + $0x138] sm:$0xff] %v1671_v41  ;;  %v1443_v54 = vmax.f32 %v1379_v44, 0.0  ;;  %v1508_v55 = vmin.f32 %v1379_v44, 0.0  ;;  %v1475_v56 = vmax.f32 %v1411_v45, 0.0  ;;  %v1540_v58 = vmin.f32 %v1411_v45, 0.0  ;;  %v2811_v61 = vpop.f32.mrf.mxu0  ;;  %v2813_v62 = vpop.f32.mrf.mxu1 }
 0x168   : > { %v1637_v57 = vadd.f32 %v1573_v46, %v1438_v35  ;;  %v1441_v59 = vmax.f32 %v1377_v47, 0.0  ;;  %v1506_v60 = vmin.f32 %v1377_v47, 0.0  ;;  %v1669_v63 = vadd.f32 %v1605_v53, %v1470_v37 }
 0x169   : > { %v1578_v0 = vmul.f32 %v2727_v52, %v1508_v55  ;;  %v1473_v1 = vmax.f32 %v1409_v48, 0.0  ;;  %v1538_v2 = vmin.f32 %v1409_v48, 0.0  ;;  %v1610_v3 = vmul.f32 %v2727_v52, %v1540_v58  ;;  %v2822_v7 = vpop.f32.mrf.mxu0  ;;  %v2824_v8 = vpop.f32.mrf.mxu1 }
 0x16a   : > { %1701 = vst [vmem:[%s2746_s28 + $0x28] sm:$0xff] %v1637_v57  ;;  %v1576_v4 = vmul.f32 %v2727_v52, %v1506_v60  ;;  %v1380_v5 = vadd.f32 %v2719_v42, %v1309_v49  ;;  %v1341_v6 = vmul.f32 %v2774_v9, %v2717_v40  ;;  %1733 = vst [vmem:[%s2746_s28 + $0x128] sm:$0xff] %v1669_v63 }
 0x16b   : > { %v1642_v10 = vadd.f32 %v1578_v0, %v1443_v54  ;;  %v1608_v11 = vmul.f32 %v2727_v52, %v1538_v2  ;;  %v1307_v12 = vmul.f32 %v2717_v40, %v876_v18  ;;  %v1339_v13 = vmul.f32 %v2717_v40, %v1004_v19  ;;  %v2830_v9 = vpop.f32.mrf.mxu0  ;;  %v2836_v24 = vpop.f32.mrf.mxu1 }
 0x16c   : > { %v1674_v14 = vadd.f32 %v1610_v3, %v1475_v56  ;;  %v1640_v15 = vadd.f32 %v1576_v4, %v1441_v59  ;;  %v1444_v16 = vmax.f32 %v1380_v5, 0.0  ;;  %v1509_v17 = vmin.f32 %v1380_v5, 0.0 }
 0x16d   : > { %1706 = vst [vmem:[%s2746_s28 + $0x50] sm:$0xff] %v1642_v10  ;;  %v1672_v20 = vadd.f32 %v1608_v11, %v1473_v1  ;;  %v1412_v21 = vadd.f32 %v2719_v42, %v1341_v6  ;;  %v1378_v22 = vadd.f32 %v2719_v42, %v1307_v12  ;;  %v1410_v23 = vadd.f32 %v2719_v42, %v1339_v13  ;;  %v2846_v27 = vpop.f32.mrf.mxu0  ;;  %v2854_v43 = vpop.f32.mrf.mxu1 }
 0x16e   : > { %1738 = vst [vmem:[%s2746_s28 + $0x150] sm:$0xff] %v1674_v14  ;;  %1704 = vst [vmem:[%s2746_s28 + $0x40] sm:$0xff] %v1640_v15  ;;  %v1579_v18 = vmul.f32 %v2727_v52, %v1509_v17  ;;  %v1312_v19 = vmul.f32 %v2786_v28, %v2717_v40  ;;  %v1344_v25 = vmul.f32 %v2788_v29, %v2717_v40 }
 0x16f   : > { %v1310_v26 = vmul.f32 %v2717_v40, %v889_v38  ;;  %1736 = vst [vmem:[%s2746_s28 + $0x140] sm:$0xff] %v1672_v20  ;;  %v1476_v30 = vmax.f32 %v1412_v21, 0.0  ;;  %v1541_v31 = vmin.f32 %v1412_v21, 0.0  ;;  %v1442_v32 = vmax.f32 %v1378_v22, 0.0  ;;  %v2856_v44 = vpop.f32.mrf.mxu0  ;;  %v2871_v1 = vpop.f32.mrf.mxu1 }
 0x170   : > { %v1507_v33 = vmin.f32 %v1378_v22, 0.0  ;;  %v1643_v34 = vadd.f32 %v1579_v18, %v1444_v16  ;;  %v1474_v35 = vmax.f32 %v1410_v23, 0.0  ;;  %v1539_v36 = vmin.f32 %v1410_v23, 0.0 }
 0x171   : > { %v1383_v37 = vadd.f32 %v2719_v42, %v1312_v19  ;;  %v1611_v28 = vmul.f32 %v2727_v52, %v1541_v31  ;;  %v1415_v29 = vadd.f32 %v2719_v42, %v1344_v25  ;;  %v1381_v38 = vadd.f32 %v2719_v42, %v1310_v26  ;;  %v2873_v2 = vpop.f32.mrf.mxu0  ;;  %v2890_v20 = vpop.f32.mrf.mxu1 }
 0x172   : > { %v1577_v41 = vmul.f32 %v2727_v52, %v1507_v33  ;;  %1707 = vst [vmem:[%s2746_s28 + $0x58] sm:$0xff] %v1643_v34  ;;  %v1609_v45 = vmul.f32 %v2727_v52, %v1539_v36  ;;  %v1342_v48 = vmul.f32 %v2717_v40, %v2796_v39  ;;  %v1313_v39 = vmul.f32 %v2805_v50, %v2717_v40 }
 0x173   : > { %v1447_v46 = vmax.f32 %v1383_v37, 0.0  ;;  %v1512_v47 = vmin.f32 %v1383_v37, 0.0  ;;  %v1675_v49 = vadd.f32 %v1611_v28, %v1476_v30  ;;  %v1479_v54 = vmax.f32 %v1415_v29, 0.0  ;;  %v2892_v21 = vpop.f32.mrf.mxu0 }
 0x174   : > { %v1641_v53 = vadd.f32 %v1577_v41, %v1442_v32  ;;  %v1544_v55 = vmin.f32 %v1415_v29, 0.0  ;;  %v1673_v56 = vadd.f32 %v1609_v45, %v1474_v35  ;;  %v1445_v58 = vmax.f32 %v1381_v38, 0.0  ;;  %v1049_v41 = vpop.f32.mrf.mxu1 }
 0x175   : > { %v1582_v57 = vmul.f32 %v2727_v52, %v1512_v47  ;;  %v1510_v59 = vmin.f32 %v1381_v38, 0.0  ;;  %1739 = vst [vmem:[%s2746_s28 + $0x158] sm:$0xff] %v1675_v49  ;;  %v1413_v63 = vadd.f32 %v2719_v42, %v1342_v48  ;;  %v1345_v0 = vmul.f32 %v2807_v51, %v2717_v40  ;;  %v2907_v29 = vpop.f32.mrf.mxu0 }
 0x176   : > { %1705 = vst [vmem:[%s2746_s28 + $0x48] sm:$0xff] %v1641_v53  ;;  %v1614_v60 = vmul.f32 %v2727_v52, %v1544_v55  ;;  %1737 = vst [vmem:[%s2746_s28 + $0x148] sm:$0xff] %v1673_v56  ;;  %v1311_v5 = vmul.f32 %v2717_v40, %v2811_v61  ;;  %v1343_v6 = vmul.f32 %v2717_v40, %v2813_v62 }
 0x177   : > { %v1646_v3 = vadd.f32 %v1582_v57, %v1447_v46  ;;  %v1580_v4 = vmul.f32 %v2727_v52, %v1510_v59  ;;  %v1477_v50 = vmax.f32 %v1413_v63, 0.0  ;;  %v1542_v11 = vmin.f32 %v1413_v63, 0.0  ;;  %v2925_v63 = vpop.f32.mrf.mxu0 }
 0x178   : > { %v1678_v10 = vadd.f32 %v1614_v60, %v1479_v54  ;;  %v1384_v51 = vadd.f32 %v2719_v42, %v1313_v39  ;;  %v1416_v13 = vadd.f32 %v2719_v42, %v1345_v0  ;;  %v1382_v14 = vadd.f32 %v2719_v42, %v1311_v5  ;;  %v2923_v60 = vpop.f32.mrf.mxu1 }
 0x179   : > { %1710 = vst [vmem:[%s2746_s28 + $0x70] sm:$0xff] %v1646_v3  ;;  %v1644_v12 = vadd.f32 %v1580_v4, %v1445_v58  ;;  %v1414_v15 = vadd.f32 %v2719_v42, %v1343_v6  ;;  %v1612_v61 = vmul.f32 %v2727_v52, %v1542_v11  ;;  %v1316_v62 = vmul.f32 %v2822_v7, %v2717_v40 }
 0x17a   : > { %1742 = vst [vmem:[%s2746_s28 + $0x170] sm:$0xff] %v1678_v10  ;;  %v1448_v16 = vmax.f32 %v1384_v51, 0.0  ;;  %v1513_v17 = vmin.f32 %v1384_v51, 0.0  ;;  %v1480_v22 = vmax.f32 %v1416_v13, 0.0  ;;  %v1545_v23 = vmin.f32 %v1416_v13, 0.0 }
 0x17b   : > { %1708 = vst [vmem:[%s2746_s28 + $0x60] sm:$0xff] %v1644_v12  ;;  %v1446_v18 = vmax.f32 %v1382_v14, 0.0  ;;  %v1511_v19 = vmin.f32 %v1382_v14, 0.0  ;;  %v1676_v25 = vadd.f32 %v1612_v61, %v1477_v50  ;;  %v1478_v30 = vmax.f32 %v1414_v15, 0.0  ;;  %v2936_v61 = vpop.f32.mrf.mxu0 }
 0x17c   : > { %v1583_v26 = vmul.f32 %v2727_v52, %v1513_v17  ;;  %v1543_v31 = vmin.f32 %v1414_v15, 0.0  ;;  %v1615_v32 = vmul.f32 %v2727_v52, %v1545_v23  ;;  %v1387_v33 = vadd.f32 %v2719_v42, %v1316_v62  ;;  %v1052_v15 = vpop.f32.mrf.mxu1 }
 0x17d   : > { %v1581_v7 = vmul.f32 %v2727_v52, %v1511_v19  ;;  %v1348_v34 = vmul.f32 %v2824_v8, %v2717_v40  ;;  %1740 = vst [vmem:[%s2746_s28 + $0x160] sm:$0xff] %v1676_v25  ;;  %v1314_v37 = vmul.f32 %v2717_v40, %v2830_v9  ;;  %v1346_v28 = vmul.f32 %v2717_v40, %v2836_v24 }
 0x17e   : > { %v1647_v35 = vadd.f32 %v1583_v26, %v1448_v16  ;;  %v1613_v36 = vmul.f32 %v2727_v52, %v1543_v31  ;;  %v1679_v38 = vadd.f32 %v1615_v32, %v1480_v22  ;;  %v1451_v46 = vmax.f32 %v1387_v33, 0.0 }
 0x17f   : > { %v1645_v45 = vadd.f32 %v1581_v7, %v1446_v18  ;;  %v1516_v8 = vmin.f32 %v1387_v33, 0.0  ;;  %v1419_v48 = vadd.f32 %v2719_v42, %v1348_v34  ;;  %v1385_v49 = vadd.f32 %v2719_v42, %v1314_v37 }
 0x180   : > { %1711 = vst [vmem:[%s2746_s28 + $0x78] sm:$0xff] %v1647_v35  ;;  %v1677_v47 = vadd.f32 %v1613_v36, %v1478_v30  ;;  %v1417_v53 = vadd.f32 %v2719_v42, %v1346_v28  ;;  %1743 = vst [vmem:[%s2746_s28 + $0x178] sm:$0xff] %v1679_v38  ;;  %v1317_v24 = vmul.f32 %v2846_v27, %v2717_v40  ;;  %v937_v35 = vpop.f32.mrf.mxu0 }
 0x181   : > { %1709 = vst [vmem:[%s2746_s28 + $0x68] sm:$0xff] %v1645_v45  ;;  %v1586_v9 = vmul.f32 %v2727_v52, %v1516_v8  ;;  %v1349_v54 = vmul.f32 %v2854_v43, %v2717_v40  ;;  %v1315_v55 = vmul.f32 %v2717_v40, %v2856_v44  ;;  %v1483_v56 = vmax.f32 %v1419_v48, 0.0 }
 0x182   : > { %1741 = vst [vmem:[%s2746_s28 + $0x168] sm:$0xff] %v1677_v47  ;;  %v1548_v57 = vmin.f32 %v1419_v48, 0.0  ;;  %v1449_v58 = vmax.f32 %v1385_v49, 0.0  ;;  %v1514_v59 = vmin.f32 %v1385_v49, 0.0  ;;  %v1481_v0 = vmax.f32 %v1417_v53, 0.0 }
 0x183   : > { %v1650_v39 = vadd.f32 %v1586_v9, %v1451_v46  ;;  %v1546_v3 = vmin.f32 %v1417_v53, 0.0  ;;  %v1388_v27 = vadd.f32 %v2719_v42, %v1317_v24  ;;  %v1420_v44 = vadd.f32 %v2719_v42, %v1349_v54 }
 0x184   : > { %v1618_v43 = vmul.f32 %v2727_v52, %v1548_v57  ;;  %v1584_v4 = vmul.f32 %v2727_v52, %v1514_v59  ;;  %v1386_v5 = vadd.f32 %v2719_v42, %v1315_v55  ;;  %v1347_v11 = vmul.f32 %v2717_v40, %v2871_v1  ;;  %v2062_v55 = vpop.f32.mrf.mxu0 }
 0x185   : > { %1714 = vst [vmem:[%s2746_s28 + $0x90] sm:$0xff] %v1650_v39  ;;  %v1616_v6 = vmul.f32 %v2727_v52, %v1546_v3  ;;  %v1452_v10 = vmax.f32 %v1388_v27, 0.0  ;;  %v1517_v50 = vmin.f32 %v1388_v27, 0.0  ;;  %v1484_v13 = vmax.f32 %v1420_v44, 0.0 }
 0x186   : > { %v1682_v51 = vadd.f32 %v1618_v43, %v1483_v56  ;;  %v1648_v12 = vadd.f32 %v1584_v4, %v1449_v58  ;;  %v1549_v14 = vmin.f32 %v1420_v44, 0.0  ;;  %v1450_v62 = vmax.f32 %v1386_v5, 0.0 }
 0x187   : > { %v1680_v16 = vadd.f32 %v1616_v6, %v1481_v0  ;;  %v1587_v17 = vmul.f32 %v2727_v52, %v1517_v50  ;;  %v1515_v22 = vmin.f32 %v1386_v5, 0.0  ;;  %v1418_v1 = vadd.f32 %v2719_v42, %v1347_v11  ;;  %v940_v11 = vpop.f32.mrf.mxu0 }
 0x188   : > { %1746 = vst [vmem:[%s2746_s28 + $0x190] sm:$0xff] %v1682_v51  ;;  %1712 = vst [vmem:[%s2746_s28 + $0x80] sm:$0xff] %v1648_v12  ;;  %v1619_v23 = vmul.f32 %v2727_v52, %v1549_v14  ;;  %v1320_v18 = vmul.f32 %v2873_v2, %v2717_v40  ;;  %v1352_v19 = vmul.f32 %v2890_v20, %v2717_v40  ;;  %v2093_v2 = vpop.f32.mrf.mxu1 }
 0x189   : > { %1744 = vst [vmem:[%s2746_s28 + $0x180] sm:$0xff] %v1680_v16  ;;  %v1651_v25 = vadd.f32 %v1587_v17, %v1452_v10  ;;  %v1585_v26 = vmul.f32 %v2727_v52, %v1515_v22  ;;  %v1318_v30 = vmul.f32 %v2717_v40, %v2892_v21  ;;  %v1350_v31 = vmul.f32 %v2717_v40, %v1049_v41 }
 0x18a   : > { %v1683_v32 = vadd.f32 %v1619_v23, %v1484_v13  ;;  %v1482_v7 = vmax.f32 %v1418_v1, 0.0  ;;  %v1547_v33 = vmin.f32 %v1418_v1, 0.0  ;;  %v1391_v34 = vadd.f32 %v2719_v42, %v1320_v18  ;;  %v1065_v54 = vpop.f32.mrf.mxu1 }
 0x18b   : > { %1715 = vst [vmem:[%s2746_s28 + $0x98] sm:$0xff] %v1651_v25  ;;  %v1649_v20 = vadd.f32 %v1585_v26, %v1450_v62  ;;  %v1423_v36 = vadd.f32 %v2719_v42, %v1352_v19  ;;  %v1389_v37 = vadd.f32 %v2719_v42, %v1318_v30  ;;  %v1421_v28 = vadd.f32 %v2719_v42, %v1350_v31  ;;  %v2065_v30 = vpop.f32.mrf.mxu0 }
 0x18c   : > { %1747 = vst [vmem:[%s2746_s28 + $0x198] sm:$0xff] %v1683_v32  ;;  %v1617_v21 = vmul.f32 %v2727_v52, %v1547_v33  ;;  %v1455_v41 = vmax.f32 %v1391_v34, 0.0  ;;  %v1520_v38 = vmin.f32 %v1391_v34, 0.0  ;;  %v1321_v45 = vmul.f32 %v2907_v29, %v2717_v40  ;;  %v2094_v50 = vpop.f32.mrf.mxu1 }
 0x18d   : > { %1713 = vst [vmem:[%s2746_s28 + $0x88] sm:$0xff] %v1649_v20  ;;  %v1487_v46 = vmax.f32 %v1423_v36, 0.0  ;;  %v1552_v8 = vmin.f32 %v1423_v36, 0.0  ;;  %v1453_v47 = vmax.f32 %v1389_v37, 0.0  ;;  %v1518_v48 = vmin.f32 %v1389_v37, 0.0 }
 0x18e   : > { %v1681_v49 = vadd.f32 %v1617_v21, %v1482_v7  ;;  %v1590_v53 = vmul.f32 %v2727_v52, %v1520_v38  ;;  %v1485_v9 = vmax.f32 %v1421_v28, 0.0  ;;  %v1550_v24 = vmin.f32 %v1421_v28, 0.0  ;;  %v1068_v26 = vpop.f32.mrf.mxu1 }
 0x18f   : > { %v1622_v56 = vmul.f32 %v2727_v52, %v1552_v8  ;;  %v1588_v57 = vmul.f32 %v2727_v52, %v1518_v48  ;;  %v1392_v29 = vadd.f32 %v2719_v42, %v1321_v45  ;;  %v1353_v58 = vmul.f32 %v2923_v60, %v2717_v40 }
 0x190   : > { %1745 = vst [vmem:[%s2746_s28 + $0x188] sm:$0xff] %v1681_v49  ;;  %v1654_v59 = vadd.f32 %v1590_v53, %v1455_v41  ;;  %v1620_v39 = vmul.f32 %v2727_v52, %v1550_v24  ;;  %v1319_v0 = vmul.f32 %v2717_v40, %v2925_v63  ;;  %v1351_v3 = vmul.f32 %v2717_v40, %v1052_v15  ;;  %v2097_v8 = vpop.f32.mrf.mxu1 }
 0x191   : > { %v1686_v27 = vadd.f32 %v1622_v56, %v1487_v46  ;;  %v1652_v43 = vadd.f32 %v1588_v57, %v1453_v47  ;;  %v1456_v4 = vmax.f32 %v1392_v29, 0.0  ;;  %v1521_v44 = vmin.f32 %v1392_v29, 0.0  ;;  %v953_v47 = vpop.f32.mrf.mxu0 }
 0x192   : > { %1718 = vst [vmem:[%s2746_s28 + $0xb0] sm:$0xff] %v1654_v59  ;;  %v1684_v5 = vadd.f32 %v1620_v39, %v1485_v9  ;;  %v1424_v60 = vadd.f32 %v2719_v42, %v1353_v58  ;;  %v1390_v6 = vadd.f32 %v2719_v42, %v1319_v0  ;;  %v1422_v10 = vadd.f32 %v2719_v42, %v1351_v3 }
 0x193   : > { %1750 = vst [vmem:[%s2746_s28 + $0x1b0] sm:$0xff] %v1686_v27  ;;  %1716 = vst [vmem:[%s2746_s28 + $0xa0] sm:$0xff] %v1652_v43  ;;  %v1591_v63 = vmul.f32 %v2727_v52, %v1521_v44  ;;  %v1324_v51 = vmul.f32 %v2936_v61, %v2717_v40  ;;  %v1356_v12 = vmul.f32 %v2093_v2, %v2717_v40  ;;  %v1081_v43 = vpop.f32.mrf.mxu1 }
 0x194   : > { %v1322_v13 = vmul.f32 %v2717_v40, %v937_v35  ;;  %1748 = vst [vmem:[%s2746_s28 + $0x1a0] sm:$0xff] %v1684_v5  ;;  %v1488_v14 = vmax.f32 %v1424_v60, 0.0  ;;  %v1553_v15 = vmin.f32 %v1424_v60, 0.0  ;;  %v1454_v16 = vmax.f32 %v1390_v6, 0.0 }
 0x195   : > { %v1519_v17 = vmin.f32 %v1390_v6, 0.0  ;;  %v1655_v62 = vadd.f32 %v1591_v63, %v1456_v4  ;;  %v1486_v22 = vmax.f32 %v1422_v10, 0.0  ;;  %v1551_v23 = vmin.f32 %v1422_v10, 0.0  ;;  %v2066_v4 = vpop.f32.mrf.mxu0 }
 0x196   : > { %v1395_v1 = vadd.f32 %v2719_v42, %v1324_v51  ;;  %v1623_v18 = vmul.f32 %v2727_v52, %v1553_v15  ;;  %v1427_v61 = vadd.f32 %v2719_v42, %v1356_v12  ;;  %v1393_v25 = vadd.f32 %v2719_v42, %v1322_v13 }
 0x197   : > { %v1589_v19 = vmul.f32 %v2727_v52, %v1519_v17  ;;  %1719 = vst [vmem:[%s2746_s28 + $0xb8] sm:$0xff] %v1655_v62  ;;  %v1621_v31 = vmul.f32 %v2727_v52, %v1551_v23  ;;  %v1354_v33 = vmul.f32 %v2717_v40, %v1065_v54  ;;  %v1325_v45 = vmul.f32 %v2062_v55, %v2717_v40  ;;  %v956_v23 = vpop.f32.mrf.mxu0 }
 0x198   : > { %v1459_v32 = vmax.f32 %v1395_v1, 0.0  ;;  %v1524_v7 = vmin.f32 %v1395_v1, 0.0  ;;  %v1687_v34 = vadd.f32 %v1623_v18, %v1488_v14  ;;  %v1491_v35 = vmax.f32 %v1427_v61, 0.0 }
 0x199   : > { %v1653_v2 = vadd.f32 %v1589_v19, %v1454_v16  ;;  %v1556_v20 = vmin.f32 %v1427_v61, 0.0  ;;  %v1685_v36 = vadd.f32 %v1621_v31, %v1486_v22  ;;  %v1457_v28 = vmax.f32 %v1393_v25, 0.0  ;;  %v2098_v22 = vpop.f32.mrf.mxu1 }
 0x19a   : > { %v1594_v37 = vmul.f32 %v2727_v52, %v1524_v7  ;;  %v1522_v21 = vmin.f32 %v1393_v25, 0.0  ;;  %1751 = vst [vmem:[%s2746_s28 + $0x1b8] sm:$0xff] %v1687_v34  ;;  %v1425_v38 = vadd.f32 %v2719_v42, %v1354_v33  ;;  %v1357_v46 = vmul.f32 %v2094_v50, %v2717_v40 }
 0x19b   : > { %1717 = vst [vmem:[%s2746_s28 + $0xa8] sm:$0xff] %v1653_v2  ;;  %v1626_v41 = vmul.f32 %v2727_v52, %v1556_v20  ;;  %1749 = vst [vmem:[%s2746_s28 + $0x1a8] sm:$0xff] %v1685_v36  ;;  %v1323_v53 = vmul.f32 %v2717_v40, %v940_v11  ;;  %v1355_v9 = vmul.f32 %v2717_v40, %v1068_v26  ;;  %v1084_v36 = vpop.f32.mrf.mxu1 }
 0x19c   : > { %v1658_v48 = vadd.f32 %v1594_v37, %v1459_v32  ;;  %v1592_v49 = vmul.f32 %v2727_v52, %v1522_v21  ;;  %v1489_v54 = vmax.f32 %v1425_v38, 0.0  ;;  %v1554_v56 = vmin.f32 %v1425_v38, 0.0 }
 0x19d   : > { %v1690_v24 = vadd.f32 %v1626_v41, %v1491_v35  ;;  %v1396_v57 = vadd.f32 %v2719_v42, %v1325_v45  ;;  %v1428_v29 = vadd.f32 %v2719_v42, %v1357_v46  ;;  %v1394_v58 = vadd.f32 %v2719_v42, %v1323_v53 }
 0x19e   : > { %1722 = vst [vmem:[%s2746_s28 + $0xd0] sm:$0xff] %v1658_v48  ;;  %v1656_v55 = vadd.f32 %v1592_v49, %v1457_v28  ;;  %v1426_v59 = vadd.f32 %v2719_v42, %v1355_v9  ;;  %v1624_v39 = vmul.f32 %v2727_v52, %v1554_v56  ;;  %v1328_v27 = vmul.f32 %v2065_v30, %v2717_v40 }
 0x19f   : > { %1754 = vst [vmem:[%s2746_s28 + $0x1d0] sm:$0xff] %v1690_v24  ;;  %v1460_v0 = vmax.f32 %v1396_v57, 0.0  ;;  %v1525_v3 = vmin.f32 %v1396_v57, 0.0  ;;  %v1492_v44 = vmax.f32 %v1428_v29, 0.0  ;;  %v1557_v5 = vmin.f32 %v1428_v29, 0.0 }
 0x1a0   : > { %1720 = vst [vmem:[%s2746_s28 + $0xc0] sm:$0xff] %v1656_v55  ;;  %v1458_v60 = vmax.f32 %v1394_v58, 0.0  ;;  %v1523_v6 = vmin.f32 %v1394_v58, 0.0  ;;  %v1688_v10 = vadd.f32 %v1624_v39, %v1489_v54  ;;  %v1490_v11 = vmax.f32 %v1426_v59, 0.0 }
 0x1a1   : > { %v1595_v50 = vmul.f32 %v2727_v52, %v1525_v3  ;;  %v1555_v63 = vmin.f32 %v1426_v59, 0.0  ;;  %v1627_v51 = vmul.f32 %v2727_v52, %v1557_v5  ;;  %v1399_v13 = vadd.f32 %v2719_v42, %v1328_v27 }
 0x1a2   : > { %v1593_v12 = vmul.f32 %v2727_v52, %v1523_v6  ;;  %v1360_v14 = vmul.f32 %v2097_v8, %v2717_v40  ;;  %1752 = vst [vmem:[%s2746_s28 + $0x1c0] sm:$0xff] %v1688_v10  ;;  %v1326_v17 = vmul.f32 %v2717_v40, %v953_v47  ;;  %v1358_v62 = vmul.f32 %v2717_v40, %v1081_v43 }
 0x1a3   : > { %v1659_v15 = vadd.f32 %v1595_v50, %v1460_v0  ;;  %v1625_v16 = vmul.f32 %v2727_v52, %v1555_v63  ;;  %v1691_v1 = vadd.f32 %v1627_v51, %v1492_v44  ;;  %v1463_v19 = vmax.f32 %v1399_v13, 0.0 }
 0x1a4   : > { %v1657_v18 = vadd.f32 %v1593_v12, %v1458_v60  ;;  %v1528_v61 = vmin.f32 %v1399_v13, 0.0  ;;  %v1431_v26 = vadd.f32 %v2719_v42, %v1360_v14  ;;  %v1397_v30 = vadd.f32 %v2719_v42, %v1326_v17 }
 0x1a5   : > { %1723 = vst [vmem:[%s2746_s28 + $0xd8] sm:$0xff] %v1659_v15  ;;  %v1689_v25 = vadd.f32 %v1625_v16, %v1490_v11  ;;  %v1429_v31 = vadd.f32 %v2719_v42, %v1358_v62  ;;  %1755 = vst [vmem:[%s2746_s28 + $0x1d8] sm:$0xff] %v1691_v1  ;;  %v1329_v7 = vmul.f32 %v2066_v4, %v2717_v40 }
 0x1a6   : > { %1721 = vst [vmem:[%s2746_s28 + $0xc8] sm:$0xff] %v1657_v18  ;;  %v1598_v32 = vmul.f32 %v2727_v52, %v1528_v61  ;;  %v1361_v33 = vmul.f32 %v2098_v22, %v2717_v40  ;;  %v1327_v34 = vmul.f32 %v2717_v40, %v956_v23  ;;  %v1495_v2 = vmax.f32 %v1431_v26, 0.0 }
 0x1a7   : > { %1753 = vst [vmem:[%s2746_s28 + $0x1c8] sm:$0xff] %v1689_v25  ;;  %v1560_v35 = vmin.f32 %v1431_v26, 0.0  ;;  %v1526_v20 = vmin.f32 %v1397_v30, 0.0  ;;  %v1461_v28 = vmax.f32 %v1397_v30, 0.0  ;;  %v1558_v21 = vmin.f32 %v1429_v31, 0.0 }
 0x1a8   : > { %v1662_v37 = vadd.f32 %v1598_v32, %v1463_v19  ;;  %v1400_v41 = vadd.f32 %v2719_v42, %v1329_v7  ;;  %v1432_v46 = vadd.f32 %v2719_v42, %v1361_v33  ;;  %v1398_v8 = vadd.f32 %v2719_v42, %v1327_v34 }
 0x1a9   : > { %v1630_v38 = vmul.f32 %v2727_v52, %v1560_v35  ;;  %v1596_v45 = vmul.f32 %v2727_v52, %v1526_v20  ;;  %v1493_v47 = vmax.f32 %v1429_v31, 0.0  ;;  %v1628_v48 = vmul.f32 %v2727_v52, %v1558_v21 }
 0x1aa   : > { %1726 = vst [vmem:[%s2746_s28 + $0xf0] sm:$0xff] %v1662_v37  ;;  %v1529_v49 = vmin.f32 %v1400_v41, 0.0  ;;  %v1359_v53 = vmul.f32 %v2717_v40, %v1084_v36  ;;  %v1561_v54 = vmin.f32 %v1432_v46, 0.0  ;;  %v1464_v57 = vmax.f32 %v1400_v41, 0.0 }
 0x1ab   : > { %v1694_v9 = vadd.f32 %v1630_v38, %v1495_v2  ;;  %v1660_v24 = vadd.f32 %v1596_v45, %v1461_v28  ;;  %v1692_v56 = vadd.f32 %v1628_v48, %v1493_v47  ;;  %v1527_v29 = vmin.f32 %v1398_v8, 0.0 }
 0x1ac   : > { %v1599_v55 = vmul.f32 %v2727_v52, %v1529_v49  ;;  %v1496_v58 = vmax.f32 %v1432_v46, 0.0  ;;  %v1631_v59 = vmul.f32 %v2727_v52, %v1561_v54  ;;  %v1430_v40 = vadd.f32 %v2719_v42, %v1359_v53 }
 0x1ad   : > { %1758 = vst [vmem:[%s2746_s28 + $0x1f0] sm:$0xff] %v1694_v9  ;;  %1724 = vst [vmem:[%s2746_s28 + $0xe0] sm:$0xff] %v1660_v24  ;;  %v1462_v0 = vmax.f32 %v1398_v8, 0.0  ;;  %v1597_v3 = vmul.f32 %v2727_v52, %v1527_v29 }
 0x1ae   : > { %1756 = vst [vmem:[%s2746_s28 + $0x1e0] sm:$0xff] %v1692_v56  ;;  %v1663_v39 = vadd.f32 %v1599_v55, %v1464_v57  ;;  %v1695_v27 = vadd.f32 %v1631_v59, %v1496_v58  ;;  %v1559_v43 = vmin.f32 %v1430_v40, 0.0  ;;  %v1494_v44 = vmax.f32 %v1430_v40, 0.0 }
 0x1af   : > { %v1661_v4 = vadd.f32 %v1597_v3, %v1462_v0 }
 0x1b0   : > { %1727 = vst [vmem:[%s2746_s28 + $0xf8] sm:$0xff] %v1663_v39  ;;  %1759 = vst [vmem:[%s2746_s28 + $0x1f8] sm:$0xff] %v1695_v27  ;;  %v1629_v5 = vmul.f32 %v2727_v52, %v1559_v43 }
 0x1b1   : > { %1725 = vst [vmem:[%s2746_s28 + $0xe8] sm:$0xff] %v1661_v4 }
 0x1b2   : > { %v1693_v42 = vadd.f32 %v1629_v5, %v1494_v44 }
 0x1b4   : > { %1757 = vst [vmem:[%s2746_s28 + $0x1e8] sm:$0xff] %v1693_v42 }
 0x1b5   : > { %2407 = shalt.err (!%p2404_p9)
}
 0x1b6   : > { %s2408_s24 = scalar_lea.hbm %s3057_s27, 8192  ;;  %s2412_s9 = scalar_lea.hbm %s3112_s5, 1441792 }
 0x1b7   : > { %p2409_p12 = scmp.ne.s32.totalorder %s3057_s27, %s2408_s24  ;;  %p2413_p0 = scmp.lt.s32.totalorder %s3057_s27, %s3112_s5 }
 0x1b8   : > { %p2414_p3 = scmp.lt.s32.totalorder %s2412_s9, %s2408_s24 }
 0x1b9   : > { %p2410_p11 = pnand %p2409_p12, %p2637_p6 }
 0x1ba   : > { %p2415_p5 = por %p2414_p3, %p2413_p0 }
 0x1bb   : > { %p2411_p13 = pneg %p2410_p11 }
 0x1bd   : > { %p2416_p8 = pnand %p2415_p5, %p2411_p13 }
 0x1bf   : > { %2419 = shalt.err (!%p2416_p8)
}
 0x1c0   : > { %s2492_s30 = smov 128   ;;  %s2493_s15 = smov 8  }
 0x1c1   : > { %2133 = dma.vmem_to_hbm [thread:$0]  (%p2637_p6), %s3059_s14, 8192, %s3057_s27, %s1761_s21, %s2492_s30, %s2492_s30, %s2493_s15  }
 0x1c2 PF: > { %p2165_p7 = scmp.ge.s32.totalorder %s2482_s23, 2  ;;  %s1790_s6 = sand.u32 1, %s2462_s18  }
 0x1c3   : > { %p3132_p10 = scmp.ne.s32.totalorder %s3122_s29, 0  ;;  %s1791_s11 = scalar_lea.sflag [#allocation5], %s1790_s6 }
 0x1c5   : > { %p2153_p2 = pnand %p2165_p7, %p3132_p10 }
 0x1c7   : > { %p2154_p1 = pneg %p2153_p2 }
 0x1c9   : > { %2457 = dma.done.wait (%p2154_p1), %s1791_s11, 8192  }
 0x1ca   : > { %2459 = vsyncadd (%p2154_p1), %s1791_s11, 4294959104  ;;  %s23_s23 = sadd.s32 1, %s2482_s23   ;;  %s3133_s18 = smov %s2466_s19 }
 0x1cb   : > { %p20_p4 = scmp.ge.s32.totalorder %s23_s23, 178   ;;  %s3134_s19 = smov %s2470_s20 }
 0x1cc   : > { %s3135_s20 = smov %s2646_s17  ;;  %s3136_s21 = smov %s2478_s22 }
 0x1cd   : > { %s3137_s22 = smov %s3139_s12  ;;  %22 = sbr.rel (!%p20_p4) target bundleno = 10 (0xa), region = 113 }
 0x1d2   :  { %1796 = vsyncpa [#allocation4], 1 }
 0x1d3   :  { %1798 = vsyncpa [#allocation4 + $0x1], 1 }
 0x1d4   :  { %1799 = vsyncpa [#allocation7], 1 }
 0x1d5   :  { %1800 = vsyncpa [#allocation10], 1 }
 0x1d6   :  { %1801 = vsyncpa [#allocation5], 1 }
 0x1d7   :  { %1803 = vsyncpa [#allocation5 + $0x1], 1 }

</bundles_post_ra>
